<compile_context>
chip_gen: v7x
topology: tpu7x:2x2x1
jax: 0.10.0
libtpu: 0.0.40
codegen_flags: <defaults>
</compile_context>

<pallas_src>
import math
from functools import partial

import jax
import jax.numpy as jnp
from jax.experimental import pallas as pl
from jax.experimental.pallas import tpu as pltpu

_VMEM_LIMIT = 48 * 1024 * 1024   # v7x-safe scoped VMEM limit
_NEG_INF = -1e30                 # finite mask value (no NaN risk with max-sub)


# ----------------------------- in-kernel helpers -----------------------------

def _layernorm(x, g, b, eps=1e-5):
    # Matches PyTorch LayerNorm (biased variance, eps=1e-5). x: (M, C) f32.
    mu = jnp.mean(x, axis=-1, keepdims=True)
    xc = x - mu
    var = jnp.mean(xc * xc, axis=-1, keepdims=True)
    return xc * jax.lax.rsqrt(var + eps) * g + b


def _gelu_tanh(x):
    # nn.GELU(approximate='tanh')
    c = math.sqrt(2.0 / math.pi)
    return 0.5 * x * (1.0 + jnp.tanh(c * (x + 0.044715 * x * x * x)))


# ------------------------- fused transformer stack ----------------------------

def gpt_blocks_kernel(x_ref, mask_ref, lnfg_ref, lnfb_ref,
                      ln1g_ref, ln1b_ref, wqkv_ref, bqkv_ref, wpr_ref, bpr_ref,
                      ln2g_ref, ln2b_ref, wfc_ref, bfc_ref, wp2_ref, bp2_ref,
                      o_ref, x_acc_ref, *, n_head):
    """One (sequence-tile, layer) grid step of the fused transformer stack."""
    layer = pl.program_id(1)
    bf16 = jnp.bfloat16

    @pl.when(layer == 0)
    def _():
        x_acc_ref[...] = x_ref[...]          # residual stream resident in VMEM

    x = x_acc_ref[...]                       # (T, C) f32
    T, C = x.shape
    hd = C // n_head
    scale = 1.0 / math.sqrt(hd)

    # ---- x = x + attn(ln_1(x)) ----
    h = _layernorm(x, ln1g_ref[...], ln1b_ref[...])
    qkv = jnp.dot(h.astype(bf16), wqkv_ref[...],
                  preferred_element_type=jnp.float32) + bqkv_ref[...]    # (T, 3C)

    # Head regrouping: one reshape + one transpose (inverse at the end).
    def split_heads(t2d):                    # (T, C) -> (H, T, hd)
        return jnp.transpose(t2d.reshape(T, n_head, hd), (1, 0, 2))

    qg = (split_heads(qkv[:, :C]) * scale).astype(bf16)   # scale folded into q
    kg = split_heads(qkv[:, C:2 * C]).astype(bf16)
    vg = split_heads(qkv[:, 2 * C:]).astype(bf16)

    att = jnp.einsum('hqd,hkd->hqk', qg, kg,
                     preferred_element_type=jnp.float32)   # (H, T, T)
    att = att + mask_ref[...][None]                        # additive causal mask
    att = att - jnp.max(att, axis=-1, keepdims=True)
    p = jnp.exp(att)
    p = p * pl.reciprocal(jnp.sum(p, axis=-1, keepdims=True), approx=True)

    yg = jnp.einsum('hqk,hkd->hqd', p.astype(bf16), vg,
                    preferred_element_type=jnp.float32)    # (H, T, hd)
    y = jnp.transpose(yg, (1, 0, 2)).reshape(T, C)         # (T, C)
    y = jnp.dot(y.astype(bf16), wpr_ref[...],
                preferred_element_type=jnp.float32) + bpr_ref[...]
    x = x + y

    # ---- x = x + mlp(ln_2(x)) ----
    h2 = _layernorm(x, ln2g_ref[...], ln2b_ref[...])
    f = jnp.dot(h2.astype(bf16), wfc_ref[...],
                preferred_element_type=jnp.float32) + bfc_ref[...]
    f = _gelu_tanh(f)
    m = jnp.dot(f.astype(bf16), wp2_ref[...],
                preferred_element_type=jnp.float32) + bp2_ref[...]
    x_acc_ref[...] = x + m

    # ---- epilogue: fused ln_f, bf16 hand-off to lm_head ----
    @pl.when(layer == pl.num_programs(1) - 1)
    def _():
        hf = _layernorm(x_acc_ref[...], lnfg_ref[...], lnfb_ref[...])
        o_ref[...] = hf.astype(jnp.bfloat16)


def run_blocks(x_flat, mask, params, B, T, n_head):
    M, C = x_flat.shape
    L = params["w_qkv"].shape[0]

    def wspec(shape):
        # stacked per-layer param (L, a, b) -> (a, b) block for layer l
        return pl.BlockSpec((None,) + shape, lambda b, l: (l, 0, 0))

    in_specs = [
        pl.BlockSpec((T, C), lambda b, l: (b, 0)),       # x, one sequence per tile
        pl.BlockSpec((T, T), lambda b, l: (0, 0)),       # causal mask (resident)
        pl.BlockSpec((1, C), lambda b, l: (0, 0)),       # ln_f gamma
        pl.BlockSpec((1, C), lambda b, l: (0, 0)),       # ln_f beta
        wspec((1, C)), wspec((1, C)),                    # ln1 g/b
        wspec((C, 3 * C)), wspec((1, 3 * C)),            # qkv
        wspec((C, C)), wspec((1, C)),                    # attn proj
        wspec((1, C)), wspec((1, C)),                    # ln2 g/b
        wspec((C, 4 * C)), wspec((1, 4 * C)),            # mlp fc
        wspec((4 * C, C)), wspec((1, C)),                # mlp proj
    ]
    return pl.pallas_call(
        partial(gpt_blocks_kernel, n_head=n_head),
        out_shape=jax.ShapeDtypeStruct((M, C), jnp.bfloat16),
        grid=(B, L),
        in_specs=in_specs,
        out_specs=pl.BlockSpec((T, C), lambda b, l: (b, 0)),
        scratch_shapes=[pltpu.VMEM((T, C), jnp.float32)],
        compiler_params=pltpu.CompilerParams(
            dimension_semantics=("parallel", "arbitrary"),
            vmem_limit_bytes=_VMEM_LIMIT),
    )(x_flat, mask, params["lnf_g"], params["lnf_b"],
      params["ln1_g"], params["ln1_b"], params["w_qkv"], params["b_qkv"],
      params["w_attn_proj"], params["b_attn_proj"],
      params["ln2_g"], params["ln2_b"], params["w_fc"], params["b_fc"],
      params["w_mlp_proj"], params["b_mlp_proj"])


# ---------------------------------- lm head ------------------------------------

def lm_head_kernel(h_ref, w_ref, o_ref):
    # h: (M, C) bf16 (ln_f already applied in the block kernel's epilogue)
    o_ref[...] = jnp.dot(h_ref[...], w_ref[...],
                         preferred_element_type=jnp.float32)


def run_lm_head(h_bf16, w_lm, tile_v=512):
    M, C = h_bf16.shape
    V = w_lm.shape[1]
    tile_v = min(tile_v, V)
    assert V % tile_v == 0, (V, tile_v)
    return pl.pallas_call(
        lm_head_kernel,
        out_shape=jax.ShapeDtypeStruct((M, V), jnp.float32),
        grid=(V // tile_v,),
        in_specs=[pl.BlockSpec((M, C), lambda j: (0, 0)),
                  pl.BlockSpec((C, tile_v), lambda j: (0, j))],
        out_specs=pl.BlockSpec((M, tile_v), lambda j: (0, j)),
        compiler_params=pltpu.CompilerParams(
            dimension_semantics=("parallel",),
            vmem_limit_bytes=_VMEM_LIMIT),
    )(h_bf16, w_lm)


# ----------------------------------- model ------------------------------------

def init_params(key, vocab_size, block_size, n_layer, n_embed):
    C = n_embed
    std = 0.02
    ks = jax.random.split(key, 6)

    def nrm(k, shape, dtype):
        return (std * jax.random.normal(k, shape)).astype(dtype)

    return {
        "wte": nrm(ks[0], (vocab_size, C), jnp.float32),
        "wpe": nrm(ks[1], (block_size, C), jnp.float32),
        "lnf_g": jnp.ones((1, C), jnp.float32),
        "lnf_b": jnp.zeros((1, C), jnp.float32),
        "w_lm": nrm(ks[2], (C, vocab_size), jnp.bfloat16),
        # per-layer params stacked along a leading (n_layer,) axis
        "ln1_g": jnp.ones((n_layer, 1, C), jnp.float32),
        "ln1_b": jnp.zeros((n_layer, 1, C), jnp.float32),
        "w_qkv": nrm(ks[3], (n_layer, C, 3 * C), jnp.bfloat16),
        "b_qkv": jnp.zeros((n_layer, 1, 3 * C), jnp.float32),
        "w_attn_proj": nrm(ks[4], (n_layer, C, C), jnp.bfloat16),
        "b_attn_proj": jnp.zeros((n_layer, 1, C), jnp.float32),
        "ln2_g": jnp.ones((n_layer, 1, C), jnp.float32),
        "ln2_b": jnp.zeros((n_layer, 1, C), jnp.float32),
        "w_fc": nrm(ks[5], (n_layer, C, 4 * C), jnp.bfloat16),
        "b_fc": jnp.zeros((n_layer, 1, 4 * C), jnp.float32),
        # mirrors nn.init.constant_(self.c_proj.weight, 1) in MLP.__init__
        "w_mlp_proj": jnp.ones((n_layer, 4 * C, C), jnp.bfloat16),
        "b_mlp_proj": jnp.zeros((n_layer, 1, C), jnp.float32),
    }


def gpt_forward(idx, params, n_head):
    # idx: (B, T) int32 token ids.  Returns logits (B, T, vocab_size) f32.
    B, T = idx.shape
    C = params["wte"].shape[1]
    tok_emb = jnp.take(params["wte"], idx, axis=0)        # (B, T, C) -- glue gather
    pos_emb = params["wpe"][:T]                           # (T, C)
    x = (tok_emb + pos_emb[None]).astype(jnp.float32).reshape(B * T, C)

    # Additive causal mask, built once; stays VMEM-resident across grid steps.
    r = jnp.arange(T)
    mask = jnp.where(r[:, None] >= r[None, :], 0.0, _NEG_INF).astype(jnp.float32)

    h = run_blocks(x, mask, params, B, T, n_head)         # (B*T, C) bf16, post ln_f
    logits = run_lm_head(h, params["w_lm"])               # (B*T, V) f32
    return logits.reshape(B, T, -1)


# ------------------------------------ main -------------------------------------

if __name__ == "__main__":
    # small config consistent with GPTConfig(..., n_layer, n_head=4, n_embed=128)
    vocab_size = 512
    block_size = 64
    n_layer = 2
    n_head = 4
    n_embed = 128
    B, T = 2, 16

    key = jax.random.PRNGKey(0)
    kp, kx = jax.random.split(key)
    params = init_params(kp, vocab_size, block_size, n_layer, n_embed)
    idx = jax.random.randint(kx, (B, T), 0, vocab_size, dtype=jnp.int32)

    fwd = jax.jit(partial(gpt_forward, n_head=n_head))
    logits = jax.block_until_ready(fwd(idx, params))

    assert logits.shape == (B, T, vocab_size), logits.shape
    assert bool(jnp.all(jnp.isfinite(logits)))
    print("KERNEL_OK")
</pallas_src>

<mosaic_0001>
module attributes {stable_mosaic.version = 11 : i64} {
  func.func @lm_head_kernel(%arg0: i32, %arg1: memref<32x128xbf16, #tpu.memory_space<vmem>>, %arg2: memref<128x512xbf16, #tpu.memory_space<vmem>>, %arg3: memref<32x512xf32, #tpu.memory_space<vmem>>) attributes {dimension_semantics = [#tpu.dimension_semantics<parallel>], iteration_bounds = array<i64: 1>, scalar_prefetch = 0 : i64, scratch_operands = 0 : i64, tpu.core_type = #tpu.core_type<tc>, window_params = [{pipeline_mode = #tpu.pipeline_mode<synchronous>, transform_indices = @transform_0, window_bounds = array<i64: 32, 128>}, {transform_indices = @transform_1, window_bounds = array<i64: 128, 512>}, {transform_indices = @transform_2, window_bounds = array<i64: 32, 512>}]} {
    %c0 = arith.constant 0 : index
    %c0_0 = arith.constant 0 : index
    %0 = vector.load %arg1[%c0, %c0_0] : memref<32x128xbf16, #tpu.memory_space<vmem>>, vector<32x128xbf16>
    %c0_1 = arith.constant 0 : index
    %c0_2 = arith.constant 0 : index
    %1 = vector.load %arg2[%c0_1, %c0_2] : memref<128x512xbf16, #tpu.memory_space<vmem>>, vector<128x512xbf16>
    %cst = arith.constant dense<0.000000e+00> : vector<32x512xf32>
    %2 = tpu.matmul %0, %1, %cst {dimension_numbers = #tpu.dot_dimension_numbers<[1], [0], [0], [1], [0, 0, 1, 1], [], []>} : vector<32x128xbf16>, vector<128x512xbf16>, vector<32x512xf32> -> vector<32x512xf32>
    %c0_3 = arith.constant 0 : index
    %c0_4 = arith.constant 0 : index
    %3 = vector.load %arg3[%c0_3, %c0_4] : memref<32x512xf32, #tpu.memory_space<vmem>>, vector<32x512xf32>
    tpu.vector_store %arg3[%c0_3, %c0_4], %2 {strides = array<i32>} : memref<32x512xf32, #tpu.memory_space<vmem>>, vector<32x512xf32>,
    return
  }
  func.func @transform_0(%arg0: i32) -> (i32, i32) {
    %c0_i32 = arith.constant 0 : i32
    %c0_i32_0 = arith.constant 0 : i32
    %c0_i32_1 = arith.constant 0 : i32
    return %c0_i32, %c0_i32_0 : i32, i32
  }
  func.func @transform_1(%arg0: i32) -> (i32, i32) {
    %c0_i32 = arith.constant 0 : i32
    %c0_i32_0 = arith.constant 0 : i32
    return %c0_i32, %arg0 : i32, i32
  }
  func.func @transform_2(%arg0: i32) -> (i32, i32) {
    %c0_i32 = arith.constant 0 : i32
    %c0_i32_0 = arith.constant 0 : i32
    return %c0_i32, %arg0 : i32, i32
  }
}

module attributes {stable_mosaic.version = 11 : i64} {
  func.func @gpt_blocks_kernel(%arg0: i32, %arg1: i32, %arg2: memref<16x128xf32, #tpu.memory_space<vmem>>, %arg3: memref<16x16xf32, #tpu.memory_space<vmem>>, %arg4: memref<1x128xf32, #tpu.memory_space<vmem>>, %arg5: memref<1x128xf32, #tpu.memory_space<vmem>>, %arg6: memref<1x1x128xf32, #tpu.memory_space<vmem>>, %arg7: memref<1x1x128xf32, #tpu.memory_space<vmem>>, %arg8: memref<1x128x384xbf16, #tpu.memory_space<vmem>>, %arg9: memref<1x1x384xf32, #tpu.memory_space<vmem>>, %arg10: memref<1x128x128xbf16, #tpu.memory_space<vmem>>, %arg11: memref<1x1x128xf32, #tpu.memory_space<vmem>>, %arg12: memref<1x1x128xf32, #tpu.memory_space<vmem>>, %arg13: memref<1x1x128xf32, #tpu.memory_space<vmem>>, %arg14: memref<1x128x512xbf16, #tpu.memory_space<vmem>>, %arg15: memref<1x1x512xf32, #tpu.memory_space<vmem>>, %arg16: memref<1x512x128xbf16, #tpu.memory_space<vmem>>, %arg17: memref<1x1x128xf32, #tpu.memory_space<vmem>>, %arg18: memref<16x128xbf16, #tpu.memory_space<vmem>>, %arg19: memref<16x128xf32, #tpu.memory_space<vmem>>) attributes {dimension_semantics = [#tpu.dimension_semantics<parallel>, #tpu.dimension_semantics<arbitrary>], iteration_bounds = array<i64: 2, 2>, scalar_prefetch = 0 : i64, scratch_operands = 1 : i64, tpu.core_type = #tpu.core_type<tc>, window_params = [{transform_indices = @transform_0, window_bounds = array<i64: 16, 128>}, {pipeline_mode = #tpu.pipeline_mode<synchronous>, transform_indices = @transform_1, window_bounds = array<i64: 16, 16>}, {pipeline_mode = #tpu.pipeline_mode<synchronous>, transform_indices = @transform_2, window_bounds = array<i64: 1, 128>}, {pipeline_mode = #tpu.pipeline_mode<synchronous>, transform_indices = @transform_3, window_bounds = array<i64: 1, 128>}, {transform_indices = @transform_4, window_bounds = array<i64: 1, 1, 128>}, {transform_indices = @transform_5, window_bounds = array<i64: 1, 1, 128>}, {transform_indices = @transform_6, window_bounds = array<i64: 1, 128, 384>}, {transform_indices = @transform_7, window_bounds = array<i64: 1, 1, 384>}, {transform_indices = @transform_8, window_bounds = array<i64: 1, 128, 128>}, {transform_indices = @transform_9, window_bounds = array<i64: 1, 1, 128>}, {transform_indices = @transform_10, window_bounds = array<i64: 1, 1, 128>}, {transform_indices = @transform_11, window_bounds = array<i64: 1, 1, 128>}, {transform_indices = @transform_12, window_bounds = array<i64: 1, 128, 512>}, {transform_indices = @transform_13, window_bounds = array<i64: 1, 1, 512>}, {transform_indices = @transform_14, window_bounds = array<i64: 1, 512, 128>}, {transform_indices = @transform_15, window_bounds = array<i64: 1, 1, 128>}, {transform_indices = @transform_16, window_bounds = array<i64: 16, 128>}]} {
    %c0_i32 = arith.constant 0 : i32
    %0 = arith.cmpi eq, %arg1, %c0_i32 : i32
    %1 = arith.extui %0 : i1 to i32
    %c0_i32_0 = arith.constant 0 : i32
    %2 = arith.cmpi ne, %1, %c0_i32_0 : i32
    scf.if %2 {
      %c0_65 = arith.constant 0 : index
      %c0_66 = arith.constant 0 : index
      %136 = vector.load %arg2[%c0_65, %c0_66] : memref<16x128xf32, #tpu.memory_space<vmem>>, vector<16x128xf32>
      %c0_67 = arith.constant 0 : index
      %c0_68 = arith.constant 0 : index
      %137 = vector.load %arg19[%c0_67, %c0_68] : memref<16x128xf32, #tpu.memory_space<vmem>>, vector<16x128xf32>
      tpu.vector_store %arg19[%c0_67, %c0_68], %136 {strides = array<i32>} : memref<16x128xf32, #tpu.memory_space<vmem>>, vector<16x128xf32>,
    } else {
    }
    %c0 = arith.constant 0 : index
    %c0_1 = arith.constant 0 : index
    %3 = vector.load %arg19[%c0, %c0_1] : memref<16x128xf32, #tpu.memory_space<vmem>>, vector<16x128xf32>
    %c0_2 = arith.constant 0 : index
    %c0_3 = arith.constant 0 : index
    %c0_4 = arith.constant 0 : index
    %4 = vector.load %arg6[%c0_2, %c0_3, %c0_4] : memref<1x1x128xf32, #tpu.memory_space<vmem>>, vector<1x1x128xf32>
    %5 = vector.shape_cast %4 : vector<1x1x128xf32> to vector<1x128xf32>
    %c0_5 = arith.constant 0 : index
    %c0_6 = arith.constant 0 : index
    %c0_7 = arith.constant 0 : index
    %6 = vector.load %arg7[%c0_5, %c0_6, %c0_7] : memref<1x1x128xf32, #tpu.memory_space<vmem>>, vector<1x1x128xf32>
    %7 = vector.shape_cast %6 : vector<1x1x128xf32> to vector<1x128xf32>
    %cst = arith.constant dense<0.000000e+00> : vector<16xf32>
    %8 = vector.multi_reduction <add>, %3, %cst [1] : vector<16x128xf32> to vector<16xf32>
    %9 = vector.shape_cast %8 : vector<16xf32> to vector<16x1xf32>
    %cst_8 = arith.constant 1.280000e+02 : f32
    %10 = vector.broadcast %cst_8 : f32 to vector<16x1xf32>
    %11 = arith.divf %9, %10 : vector<16x1xf32>
    %12 = vector.broadcast %11 : vector<16x1xf32> to vector<16x128xf32>
    %13 = arith.subf %3, %12 : vector<16x128xf32>
    %14 = arith.mulf %13, %13 : vector<16x128xf32>
    %cst_9 = arith.constant dense<0.000000e+00> : vector<16xf32>
    %15 = vector.multi_reduction <add>, %14, %cst_9 [1] : vector<16x128xf32> to vector<16xf32>
    %16 = vector.shape_cast %15 : vector<16xf32> to vector<16x1xf32>
    %cst_10 = arith.constant 1.280000e+02 : f32
    %17 = vector.broadcast %cst_10 : f32 to vector<16x1xf32>
    %18 = arith.divf %16, %17 : vector<16x1xf32>
    %cst_11 = arith.constant 9.99999974E-6 : f32
    %19 = vector.broadcast %cst_11 : f32 to vector<16x1xf32>
    %20 = arith.addf %18, %19 : vector<16x1xf32>
    %21 = math.rsqrt %20 : vector<16x1xf32>
    %22 = vector.broadcast %21 : vector<16x1xf32> to vector<16x128xf32>
    %23 = arith.mulf %13, %22 : vector<16x128xf32>
    %24 = vector.broadcast %5 : vector<1x128xf32> to vector<16x128xf32>
    %25 = arith.mulf %23, %24 : vector<16x128xf32>
    %26 = vector.broadcast %7 : vector<1x128xf32> to vector<16x128xf32>
    %27 = arith.addf %25, %26 : vector<16x128xf32>
    %28 = arith.truncf %27 : vector<16x128xf32> to vector<16x128xbf16>
    %c0_12 = arith.constant 0 : index
    %c0_13 = arith.constant 0 : index
    %c0_14 = arith.constant 0 : index
    %29 = vector.load %arg8[%c0_12, %c0_13, %c0_14] : memref<1x128x384xbf16, #tpu.memory_space<vmem>>, vector<1x128x384xbf16>
    %30 = vector.shape_cast %29 : vector<1x128x384xbf16> to vector<128x384xbf16>
    %cst_15 = arith.constant dense<0.000000e+00> : vector<16x384xf32>
    %31 = tpu.matmul %28, %30, %cst_15 {dimension_numbers = #tpu.dot_dimension_numbers<[1], [0], [0], [1], [0, 0, 1, 1], [], []>} : vector<16x128xbf16>, vector<128x384xbf16>, vector<16x384xf32> -> vector<16x384xf32>
    %c0_16 = arith.constant 0 : index
    %c0_17 = arith.constant 0 : index
    %c0_18 = arith.constant 0 : index
    %32 = vector.load %arg9[%c0_16, %c0_17, %c0_18] : memref<1x1x384xf32, #tpu.memory_space<vmem>>, vector<1x1x384xf32>
    %33 = vector.shape_cast %32 : vector<1x1x384xf32> to vector<1x384xf32>
    %34 = vector.broadcast %33 : vector<1x384xf32> to vector<16x384xf32>
    %35 = arith.addf %31, %34 : vector<16x384xf32>
    %36 = vector.extract_strided_slice %35 {offsets = [0, 0], sizes = [16, 128], strides = [1, 1]} : vector<16x384xf32> to vector<16x128xf32>
    %37 = vector.shape_cast %36 : vector<16x128xf32> to vector<16x4x32xf32>
    %38 = tpu.transpose %37, [1, 0, 2] : vector<16x4x32xf32> -> vector<4x16x32xf32>
    %cst_19 = arith.constant 0.176776692 : f32
    %39 = vector.broadcast %cst_19 : f32 to vector<4x16x32xf32>
    %40 = arith.mulf %38, %39 : vector<4x16x32xf32>
    %41 = arith.truncf %40 : vector<4x16x32xf32> to vector<4x16x32xbf16>
    %42 = vector.extract_strided_slice %35 {offsets = [0, 128], sizes = [16, 128], strides = [1, 1]} : vector<16x384xf32> to vector<16x128xf32>
    %43 = vector.shape_cast %42 : vector<16x128xf32> to vector<16x4x32xf32>
    %44 = tpu.transpose %43, [1, 0, 2] : vector<16x4x32xf32> -> vector<4x16x32xf32>
    %45 = arith.truncf %44 : vector<4x16x32xf32> to vector<4x16x32xbf16>
    %46 = vector.extract_strided_slice %35 {offsets = [0, 256], sizes = [16, 128], strides = [1, 1]} : vector<16x384xf32> to vector<16x128xf32>
    %47 = vector.shape_cast %46 : vector<16x128xf32> to vector<16x4x32xf32>
    %48 = tpu.transpose %47, [1, 0, 2] : vector<16x4x32xf32> -> vector<4x16x32xf32>
    %49 = arith.truncf %48 : vector<4x16x32xf32> to vector<4x16x32xbf16>
    "tpu.trace_start"() <{level = 10 : i32, message = "hqd,hkd->hqk"}> : () -> ()
    %cst_20 = arith.constant dense<0.000000e+00> : vector<4x16x16xf32>
    %50 = tpu.matmul %41, %45, %cst_20 {dimension_numbers = #tpu.dot_dimension_numbers<[2], [2], [1], [1], [0, 0, 0, 1, 1, 1], [0], [0]>} : vector<4x16x32xbf16>, vector<4x16x32xbf16>, vector<4x16x16xf32> -> vector<4x16x16xf32>
    "tpu.trace_stop"() : () -> ()
    %c0_21 = arith.constant 0 : index
    %c0_22 = arith.constant 0 : index
    %51 = vector.load %arg3[%c0_21, %c0_22] : memref<16x16xf32, #tpu.memory_space<vmem>>, vector<16x16xf32>
    %52 = vector.shape_cast %51 : vector<16x16xf32> to vector<1x16x16xf32>
    %53 = vector.broadcast %52 : vector<1x16x16xf32> to vector<4x16x16xf32>
    %54 = arith.addf %50, %53 : vector<4x16x16xf32>
    %cst_23 = arith.constant dense<0xFF800000> : vector<4x16xf32>
    %55 = vector.multi_reduction <maximumf>, %54, %cst_23 [2] : vector<4x16x16xf32> to vector<4x16xf32>
    %56 = vector.shape_cast %55 : vector<4x16xf32> to vector<4x16x1xf32>
    %57 = vector.broadcast %56 : vector<4x16x1xf32> to vector<4x16x16xf32>
    %58 = arith.subf %54, %57 : vector<4x16x16xf32>
    %59 = math.exp %58 : vector<4x16x16xf32>
    %cst_24 = arith.constant dense<0.000000e+00> : vector<4x16xf32>
    %60 = vector.multi_reduction <add>, %59, %cst_24 [2] : vector<4x16x16xf32> to vector<4x16xf32>
    %61 = vector.shape_cast %60 : vector<4x16xf32> to vector<4x16x1xf32>
    %62 = tpu.reciprocal %61 {approx = true} : vector<4x16x1xf32> -> vector<4x16x1xf32>
    %63 = vector.broadcast %62 : vector<4x16x1xf32> to vector<4x16x16xf32>
    %64 = arith.mulf %59, %63 : vector<4x16x16xf32>
    %65 = arith.truncf %64 : vector<4x16x16xf32> to vector<4x16x16xbf16>
    "tpu.trace_start"() <{level = 10 : i32, message = "hqk,hkd->hqd"}> : () -> ()
    %cst_25 = arith.constant dense<0.000000e+00> : vector<4x16x32xf32>
    %66 = tpu.matmul %65, %49, %cst_25 {dimension_numbers = #tpu.dot_dimension_numbers<[2], [1], [1], [2], [0, 0, 0, 1, 1, 2], [0], [0]>} : vector<4x16x16xbf16>, vector<4x16x32xbf16>, vector<4x16x32xf32> -> vector<4x16x32xf32>
    "tpu.trace_stop"() : () -> ()
    %67 = tpu.transpose %66, [1, 0, 2] : vector<4x16x32xf32> -> vector<16x4x32xf32>
    %68 = vector.shape_cast %67 : vector<16x4x32xf32> to vector<16x128xf32>
    %69 = arith.truncf %68 : vector<16x128xf32> to vector<16x128xbf16>
    %c0_26 = arith.constant 0 : index
    %c0_27 = arith.constant 0 : index
    %c0_28 = arith.constant 0 : index
    %70 = vector.load %arg10[%c0_26, %c0_27, %c0_28] : memref<1x128x128xbf16, #tpu.memory_space<vmem>>, vector<1x128x128xbf16>
    %71 = vector.shape_cast %70 : vector<1x128x128xbf16> to vector<128x128xbf16>
    %cst_29 = arith.constant dense<0.000000e+00> : vector<16x128xf32>
    %72 = tpu.matmul %69, %71, %cst_29 {dimension_numbers = #tpu.dot_dimension_numbers<[1], [0], [0], [1], [0, 0, 1, 1], [], []>} : vector<16x128xbf16>, vector<128x128xbf16>, vector<16x128xf32> -> vector<16x128xf32>
    %c0_30 = arith.constant 0 : index
    %c0_31 = arith.constant 0 : index
    %c0_32 = arith.constant 0 : index
    %73 = vector.load %arg11[%c0_30, %c0_31, %c0_32] : memref<1x1x128xf32, #tpu.memory_space<vmem>>, vector<1x1x128xf32>
    %74 = vector.shape_cast %73 : vector<1x1x128xf32> to vector<1x128xf32>
    %75 = vector.broadcast %74 : vector<1x128xf32> to vector<16x128xf32>
    %76 = arith.addf %72, %75 : vector<16x128xf32>
    %77 = arith.addf %3, %76 : vector<16x128xf32>
    %c0_33 = arith.constant 0 : index
    %c0_34 = arith.constant 0 : index
    %c0_35 = arith.constant 0 : index
    %78 = vector.load %arg12[%c0_33, %c0_34, %c0_35] : memref<1x1x128xf32, #tpu.memory_space<vmem>>, vector<1x1x128xf32>
    %79 = vector.shape_cast %78 : vector<1x1x128xf32> to vector<1x128xf32>
    %c0_36 = arith.constant 0 : index
    %c0_37 = arith.constant 0 : index
    %c0_38 = arith.constant 0 : index
    %80 = vector.load %arg13[%c0_36, %c0_37, %c0_38] : memref<1x1x128xf32, #tpu.memory_space<vmem>>, vector<1x1x128xf32>
    %81 = vector.shape_cast %80 : vector<1x1x128xf32> to vector<1x128xf32>
    %cst_39 = arith.constant dense<0.000000e+00> : vector<16xf32>
    %82 = vector.multi_reduction <add>, %77, %cst_39 [1] : vector<16x128xf32> to vector<16xf32>
    %83 = vector.shape_cast %82 : vector<16xf32> to vector<16x1xf32>
    %cst_40 = arith.constant 1.280000e+02 : f32
    %84 = vector.broadcast %cst_40 : f32 to vector<16x1xf32>
    %85 = arith.divf %83, %84 : vector<16x1xf32>
    %86 = vector.broadcast %85 : vector<16x1xf32> to vector<16x128xf32>
    %87 = arith.subf %77, %86 : vector<16x128xf32>
    %88 = arith.mulf %87, %87 : vector<16x128xf32>
    %cst_41 = arith.constant dense<0.000000e+00> : vector<16xf32>
    %89 = vector.multi_reduction <add>, %88, %cst_41 [1] : vector<16x128xf32> to vector<16xf32>
    %90 = vector.shape_cast %89 : vector<16xf32> to vector<16x1xf32>
    %cst_42 = arith.constant 1.280000e+02 : f32
    %91 = vector.broadcast %cst_42 : f32 to vector<16x1xf32>
    %92 = arith.divf %90, %91 : vector<16x1xf32>
    %cst_43 = arith.constant 9.99999974E-6 : f32
    %93 = vector.broadcast %cst_43 : f32 to vector<16x1xf32>
    %94 = arith.addf %92, %93 : vector<16x1xf32>
    %95 = math.rsqrt %94 : vector<16x1xf32>
    %96 = vector.broadcast %95 : vector<16x1xf32> to vector<16x128xf32>
    %97 = arith.mulf %87, %96 : vector<16x128xf32>
    %98 = vector.broadcast %79 : vector<1x128xf32> to vector<16x128xf32>
    %99 = arith.mulf %97, %98 : vector<16x128xf32>
    %100 = vector.broadcast %81 : vector<1x128xf32> to vector<16x128xf32>
    %101 = arith.addf %99, %100 : vector<16x128xf32>
    %102 = arith.truncf %101 : vector<16x128xf32> to vector<16x128xbf16>
    %c0_44 = arith.constant 0 : index
    %c0_45 = arith.constant 0 : index
    %c0_46 = arith.constant 0 : index
    %103 = vector.load %arg14[%c0_44, %c0_45, %c0_46] : memref<1x128x512xbf16, #tpu.memory_space<vmem>>, vector<1x128x512xbf16>
    %104 = vector.shape_cast %103 : vector<1x128x512xbf16> to vector<128x512xbf16>
    %cst_47 = arith.constant dense<0.000000e+00> : vector<16x512xf32>
    %105 = tpu.matmul %102, %104, %cst_47 {dimension_numbers = #tpu.dot_dimension_numbers<[1], [0], [0], [1], [0, 0, 1, 1], [], []>} : vector<16x128xbf16>, vector<128x512xbf16>, vector<16x512xf32> -> vector<16x512xf32>
    %c0_48 = arith.constant 0 : index
    %c0_49 = arith.constant 0 : index
    %c0_50 = arith.constant 0 : index
    %106 = vector.load %arg15[%c0_48, %c0_49, %c0_50] : memref<1x1x512xf32, #tpu.memory_space<vmem>>, vector<1x1x512xf32>
    %107 = vector.shape_cast %106 : vector<1x1x512xf32> to vector<1x512xf32>
    %108 = vector.broadcast %107 : vector<1x512xf32> to vector<16x512xf32>
    %109 = arith.addf %105, %108 : vector<16x512xf32>
    %cst_51 = arith.constant 5.000000e-01 : f32
    %110 = vector.broadcast %cst_51 : f32 to vector<16x512xf32>
    %111 = arith.mulf %110, %109 : vector<16x512xf32>
    %cst_52 = arith.constant 4.471500e-02 : f32
    %112 = vector.broadcast %cst_52 : f32 to vector<16x512xf32>
    %113 = arith.mulf %112, %109 : vector<16x512xf32>
    %114 = arith.mulf %113, %109 : vector<16x512xf32>
    %115 = arith.mulf %114, %109 : vector<16x512xf32>
    %116 = arith.addf %109, %115 : vector<16x512xf32>
    %cst_53 = arith.constant 0.797884583 : f32
    %117 = vector.broadcast %cst_53 : f32 to vector<16x512xf32>
    %118 = arith.mulf %117, %116 : vector<16x512xf32>
    %119 = math.tanh %118 : vector<16x512xf32>
    %cst_54 = arith.constant 1.000000e+00 : f32
    %120 = vector.broadcast %cst_54 : f32 to vector<16x512xf32>
    %121 = arith.addf %120, %119 : vector<16x512xf32>
    %122 = arith.mulf %111, %121 : vector<16x512xf32>
    %123 = arith.truncf %122 : vector<16x512xf32> to vector<16x512xbf16>
    %c0_55 = arith.constant 0 : index
    %c0_56 = arith.constant 0 : index
    %c0_57 = arith.constant 0 : index
    %124 = vector.load %arg16[%c0_55, %c0_56, %c0_57] : memref<1x512x128xbf16, #tpu.memory_space<vmem>>, vector<1x512x128xbf16>
    %125 = vector.shape_cast %124 : vector<1x512x128xbf16> to vector<512x128xbf16>
    %cst_58 = arith.constant dense<0.000000e+00> : vector<16x128xf32>
    %126 = tpu.matmul %123, %125, %cst_58 {dimension_numbers = #tpu.dot_dimension_numbers<[1], [0], [0], [1], [0, 0, 1, 1], [], []>} : vector<16x512xbf16>, vector<512x128xbf16>, vector<16x128xf32> -> vector<16x128xf32>
    %c0_59 = arith.constant 0 : index
    %c0_60 = arith.constant 0 : index
    %c0_61 = arith.constant 0 : index
    %127 = vector.load %arg17[%c0_59, %c0_60, %c0_61] : memref<1x1x128xf32, #tpu.memory_space<vmem>>, vector<1x1x128xf32>
    %128 = vector.shape_cast %127 : vector<1x1x128xf32> to vector<1x128xf32>
    %129 = vector.broadcast %128 : vector<1x128xf32> to vector<16x128xf32>
    %130 = arith.addf %126, %129 : vector<16x128xf32>
    %131 = arith.addf %77, %130 : vector<16x128xf32>
    %c0_62 = arith.constant 0 : index
    %c0_63 = arith.constant 0 : index
    %132 = vector.load %arg19[%c0_62, %c0_63] : memref<16x128xf32, #tpu.memory_space<vmem>>, vector<16x128xf32>
    tpu.vector_store %arg19[%c0_62, %c0_63], %131 {strides = array<i32>} : memref<16x128xf32, #tpu.memory_space<vmem>>, vector<16x128xf32>,
    %c1_i32 = arith.constant 1 : i32
    %133 = arith.cmpi eq, %arg1, %c1_i32 : i32
    %134 = arith.extui %133 : i1 to i32
    %c0_i32_64 = arith.constant 0 : i32
    %135 = arith.cmpi ne, %134, %c0_i32_64 : i32
    scf.if %135 {
      %c0_65 = arith.constant 0 : index
      %c0_66 = arith.constant 0 : index
      %136 = vector.load %arg19[%c0_65, %c0_66] : memref<16x128xf32, #tpu.memory_space<vmem>>, vector<16x128xf32>
      %c0_67 = arith.constant 0 : index
      %c0_68 = arith.constant 0 : index
      %137 = vector.load %arg4[%c0_67, %c0_68] : memref<1x128xf32, #tpu.memory_space<vmem>>, vector<1x128xf32>
      %c0_69 = arith.constant 0 : index
      %c0_70 = arith.constant 0 : index
      %138 = vector.load %arg5[%c0_69, %c0_70] : memref<1x128xf32, #tpu.memory_space<vmem>>, vector<1x128xf32>
      %cst_71 = arith.constant dense<0.000000e+00> : vector<16xf32>
      %139 = vector.multi_reduction <add>, %136, %cst_71 [1] : vector<16x128xf32> to vector<16xf32>
      %140 = vector.shape_cast %139 : vector<16xf32> to vector<16x1xf32>
      %cst_72 = arith.constant 1.280000e+02 : f32
      %141 = vector.broadcast %cst_72 : f32 to vector<16x1xf32>
      %142 = arith.divf %140, %141 : vector<16x1xf32>
      %143 = vector.broadcast %142 : vector<16x1xf32> to vector<16x128xf32>
      %144 = arith.subf %136, %143 : vector<16x128xf32>
      %145 = arith.mulf %144, %144 : vector<16x128xf32>
      %cst_73 = arith.constant dense<0.000000e+00> : vector<16xf32>
      %146 = vector.multi_reduction <add>, %145, %cst_73 [1] : vector<16x128xf32> to vector<16xf32>
      %147 = vector.shape_cast %146 : vector<16xf32> to vector<16x1xf32>
      %cst_74 = arith.constant 1.280000e+02 : f32
      %148 = vector.broadcast %cst_74 : f32 to vector<16x1xf32>
      %149 = arith.divf %147, %148 : vector<16x1xf32>
      %cst_75 = arith.constant 9.99999974E-6 : f32
      %150 = vector.broadcast %cst_75 : f32 to vector<16x1xf32>
      %151 = arith.addf %149, %150 : vector<16x1xf32>
      %152 = math.rsqrt %151 : vector<16x1xf32>
      %153 = vector.broadcast %152 : vector<16x1xf32> to vector<16x128xf32>
      %154 = arith.mulf %144, %153 : vector<16x128xf32>
      %155 = vector.broadcast %137 : vector<1x128xf32> to vector<16x128xf32>
      %156 = arith.mulf %154, %155 : vector<16x128xf32>
      %157 = vector.broadcast %138 : vector<1x128xf32> to vector<16x128xf32>
      %158 = arith.addf %156, %157 : vector<16x128xf32>
      %159 = arith.truncf %158 : vector<16x128xf32> to vector<16x128xbf16>
      %c0_76 = arith.constant 0 : index
      %c0_77 = arith.constant 0 : index
      %160 = vector.load %arg18[%c0_76, %c0_77] : memref<16x128xbf16, #tpu.memory_space<vmem>>, vector<16x128xbf16>
      tpu.vector_store %arg18[%c0_76, %c0_77], %159 {strides = array<i32>} : memref<16x128xbf16, #tpu.memory_space<vmem>>, vector<16x128xbf16>,
    } else {
    }
    return
  }
  func.func @transform_0(%arg0: i32, %arg1: i32) -> (i32, i32) {
    %c0_i32 = arith.constant 0 : i32
    %c0_i32_0 = arith.constant 0 : i32
    return %arg0, %c0_i32 : i32, i32
  }
  func.func @transform_1(%arg0: i32, %arg1: i32) -> (i32, i32) {
    %c0_i32 = arith.constant 0 : i32
    %c0_i32_0 = arith.constant 0 : i32
    %c0_i32_1 = arith.constant 0 : i32
    return %c0_i32, %c0_i32_0 : i32, i32
  }
  func.func @transform_2(%arg0: i32, %arg1: i32) -> (i32, i32) {
    %c0_i32 = arith.constant 0 : i32
    %c0_i32_0 = arith.constant 0 : i32
    %c0_i32_1 = arith.constant 0 : i32
    return %c0_i32, %c0_i32_0 : i32, i32
  }
  func.func @transform_3(%arg0: i32, %arg1: i32) -> (i32, i32) {
    %c0_i32 = arith.constant 0 : i32
    %c0_i32_0 = arith.constant 0 : i32
    %c0_i32_1 = arith.constant 0 : i32
    return %c0_i32, %c0_i32_0 : i32, i32
  }
  func.func @transform_4(%arg0: i32, %arg1: i32) -> (i32, i32, i32) {
    %c0_i32 = arith.constant 0 : i32
    %c0_i32_0 = arith.constant 0 : i32
    %c0_i32_1 = arith.constant 0 : i32
    return %arg1, %c0_i32, %c0_i32_0 : i32, i32, i32
  }
  func.func @transform_5(%arg0: i32, %arg1: i32) -> (i32, i32, i32) {
    %c0_i32 = arith.constant 0 : i32
    %c0_i32_0 = arith.constant 0 : i32
    %c0_i32_1 = arith.constant 0 : i32
    return %arg1, %c0_i32, %c0_i32_0 : i32, i32, i32
  }
  func.func @transform_6(%arg0: i32, %arg1: i32) -> (i32, i32, i32) {
    %c0_i32 = arith.constant 0 : i32
    %c0_i32_0 = arith.constant 0 : i32
    %c0_i32_1 = arith.constant 0 : i32
    return %arg1, %c0_i32, %c0_i32_0 : i32, i32, i32
  }
  func.func @transform_7(%arg0: i32, %arg1: i32) -> (i32, i32, i32) {
    %c0_i32 = arith.constant 0 : i32
    %c0_i32_0 = arith.constant 0 : i32
    %c0_i32_1 = arith.constant 0 : i32
    return %arg1, %c0_i32, %c0_i32_0 : i32, i32, i32
  }
  func.func @transform_8(%arg0: i32, %arg1: i32) -> (i32, i32, i32) {
    %c0_i32 = arith.constant 0 : i32
    %c0_i32_0 = arith.constant 0 : i32
    %c0_i32_1 = arith.constant 0 : i32
    return %arg1, %c0_i32, %c0_i32_0 : i32, i32, i32
  }
  func.func @transform_9(%arg0: i32, %arg1: i32) -> (i32, i32, i32) {
    %c0_i32 = arith.constant 0 : i32
    %c0_i32_0 = arith.constant 0 : i32
    %c0_i32_1 = arith.constant 0 : i32
    return %arg1, %c0_i32, %c0_i32_0 : i32, i32, i32
  }
  func.func @transform_10(%arg0: i32, %arg1: i32) -> (i32, i32, i32) {
    %c0_i32 = arith.constant 0 : i32
    %c0_i32_0 = arith.constant 0 : i32
    %c0_i32_1 = arith.constant 0 : i32
    return %arg1, %c0_i32, %c0_i32_0 : i32, i32, i32
  }
  func.func @transform_11(%arg0: i32, %arg1: i32) -> (i32, i32, i32) {
    %c0_i32 = arith.constant 0 : i32
    %c0_i32_0 = arith.constant 0 : i32
    %c0_i32_1 = arith.constant 0 : i32
    return %arg1, %c0_i32, %c0_i32_0 : i32, i32, i32
  }
  func.func @transform_12(%arg0: i32, %arg1: i32) -> (i32, i32, i32) {
    %c0_i32 = arith.constant 0 : i32
    %c0_i32_0 = arith.constant 0 : i32
    %c0_i32_1 = arith.constant 0 : i32
    return %arg1, %c0_i32, %c0_i32_0 : i32, i32, i32
  }
  func.func @transform_13(%arg0: i32, %arg1: i32) -> (i32, i32, i32) {
    %c0_i32 = arith.constant 0 : i32
    %c0_i32_0 = arith.constant 0 : i32
    %c0_i32_1 = arith.constant 0 : i32
    return %arg1, %c0_i32, %c0_i32_0 : i32, i32, i32
  }
  func.func @transform_14(%arg0: i32, %arg1: i32) -> (i32, i32, i32) {
    %c0_i32 = arith.constant 0 : i32
    %c0_i32_0 = arith.constant 0 : i32
    %c0_i32_1 = arith.constant 0 : i32
    return %arg1, %c0_i32, %c0_i32_0 : i32, i32, i32
  }
  func.func @transform_15(%arg0: i32, %arg1: i32) -> (i32, i32, i32) {
    %c0_i32 = arith.constant 0 : i32
    %c0_i32_0 = arith.constant 0 : i32
    %c0_i32_1 = arith.constant 0 : i32
    return %arg1, %c0_i32, %c0_i32_0 : i32, i32, i32
  }
  func.func @transform_16(%arg0: i32, %arg1: i32) -> (i32, i32) {
    %c0_i32 = arith.constant 0 : i32
    %c0_i32_0 = arith.constant 0 : i32
    return %arg0, %c0_i32 : i32, i32
  }
}

</mosaic_0001>

<bundles_post_ra>
// kernel: gpt_forward.3
= control target key start
LH: loop header
LB: loop body
LE: loop exit
PB: predicated region body
PF: predicated region fallthrough
CT: control target
= control target key end

     0   :  { %v471_v2 = vmov 0   ;;  %s608_s0 = inlined_call_operand.vmem [shape: bf16[32,128], index: 0, kind: input, shape index: {}]   ;;  %s609_s1 = inlined_call_operand.vmem [shape: bf16[128,512], index: 1, kind: input, shape index: {}]   ;;  %s610_s2 = inlined_call_operand.hbm [shape: f32[32,512], index: 2, kind: output, shape index: {}]  }
   0x1   :  { %v397_v0 = vld [vmem:[%s609_s1 + $0x4] ss:$16 sps:$4 sm:$0xff]   ;;  %v399_v1 = vld [vmem:[%s609_s1 + $0xc] ss:$16 sps:$4 sm:$0xff]   ;;  %253 = vmatprep.mubr.bf16.mxu0 %v471_v2  ;;  %306 = vmatprep.mubr.bf16.mxu1 %v471_v2  ;;  %v401_v3 = vld [vmem:[%s609_s1] ss:$16 sps:$4 sm:$0xff]  }
   0x2   :  { %221 = vmatprep.subr.bf16.mxu0 %v397_v0  ;;  %v402_v4 = vld [vmem:[%s609_s1 + $0x8] ss:$16 sps:$4 sm:$0xff]   ;;  %274 = vmatprep.subr.bf16.mxu1 %v399_v1  ;;  %v403_v5 = vld [vmem:[%s609_s1 + $0x24] ss:$16 sps:$4 sm:$0xff]   ;;  %v405_v6 = vld [vmem:[%s609_s1 + $0x2c] ss:$16 sps:$4 sm:$0xff]  }
   0x3   :  { %222 = vmatpush1.bf16.msra.mxu0 %v401_v3  ;;  %275 = vmatpush1.bf16.msra.mxu1 %v402_v4  ;;  %v407_v7 = vld [vmem:[%s609_s1 + $0x20] ss:$16 sps:$4 sm:$0xff]   ;;  %v408_v8 = vld [vmem:[%s609_s1 + $0x28] ss:$16 sps:$4 sm:$0xff]   ;;  %v409_v9 = vld [vmem:[%s609_s1 + $0x44] ss:$16 sps:$4 sm:$0xff]  }
   0x4   :  { %223 = vmatprep.subr.bf16.mxu0 %v403_v5  ;;  %276 = vmatprep.subr.bf16.mxu1 %v405_v6  ;;  %v411_v10 = vld [vmem:[%s609_s1 + $0x4c] ss:$16 sps:$4 sm:$0xff]   ;;  %v413_v11 = vld [vmem:[%s609_s1 + $0x40] ss:$16 sps:$4 sm:$0xff]   ;;  %v414_v12 = vld [vmem:[%s609_s1 + $0x48] ss:$16 sps:$4 sm:$0xff]  }
   0x5   :  { %v415_v13 = vld [vmem:[%s609_s1 + $0x64] ss:$16 sps:$4 sm:$0xff]   ;;  %v417_v14 = vld [vmem:[%s609_s1 + $0x6c] ss:$16 sps:$4 sm:$0xff]   ;;  %v419_v15 = vld [vmem:[%s609_s1 + $0x60] ss:$16 sps:$4 sm:$0xff]  }
   0x6   :  { %v420_v16 = vld [vmem:[%s609_s1 + $0x68] ss:$16 sps:$4 sm:$0xff]   ;;  %v421_v17 = vld [vmem:[%s609_s1 + $0x84] ss:$16 sps:$4 sm:$0xff]   ;;  %v423_v18 = vld [vmem:[%s609_s1 + $0x8c] ss:$16 sps:$4 sm:$0xff]  }
   0x7   :  { %224 = vmatpush1.bf16.msra.mxu0 %v407_v7  ;;  %277 = vmatpush1.bf16.msra.mxu1 %v408_v8  ;;  %v425_v19 = vld [vmem:[%s609_s1 + $0x80] ss:$16 sps:$4 sm:$0xff]   ;;  %v426_v20 = vld [vmem:[%s609_s1 + $0x88] ss:$16 sps:$4 sm:$0xff]   ;;  %v427_v21 = vld [vmem:[%s609_s1 + $0xa4] ss:$16 sps:$4 sm:$0xff]  }
   0x8   :  { %225 = vmatprep.subr.bf16.mxu0 %v409_v9  ;;  %278 = vmatprep.subr.bf16.mxu1 %v411_v10  ;;  %v429_v22 = vld [vmem:[%s609_s1 + $0xac] ss:$16 sps:$4 sm:$0xff]   ;;  %v431_v23 = vld [vmem:[%s609_s1 + $0xa0] ss:$16 sps:$4 sm:$0xff]   ;;  %v432_v24 = vld [vmem:[%s609_s1 + $0xa8] ss:$16 sps:$4 sm:$0xff]  }
   0x9   :  { %v433_v25 = vld [vmem:[%s609_s1 + $0xc4] ss:$16 sps:$4 sm:$0xff]   ;;  %v435_v26 = vld [vmem:[%s609_s1 + $0xcc] ss:$16 sps:$4 sm:$0xff]  }
   0xb   :  { %226 = vmatpush1.bf16.msra.mxu0 %v413_v11  ;;  %279 = vmatpush1.bf16.msra.mxu1 %v414_v12 }
   0xc   :  { %227 = vmatprep.subr.bf16.mxu0 %v415_v13  ;;  %280 = vmatprep.subr.bf16.mxu1 %v417_v14 }
   0xf   :  { %228 = vmatpush1.bf16.msra.mxu0 %v419_v15  ;;  %281 = vmatpush1.bf16.msra.mxu1 %v420_v16 }
  0x10   :  { %229 = vmatprep.subr.bf16.mxu0 %v421_v17  ;;  %282 = vmatprep.subr.bf16.mxu1 %v423_v18 }
  0x13   :  { %230 = vmatpush1.bf16.msra.mxu0 %v425_v19  ;;  %283 = vmatpush1.bf16.msra.mxu1 %v426_v20 }
  0x14   :  { %231 = vmatprep.subr.bf16.mxu0 %v427_v21  ;;  %284 = vmatprep.subr.bf16.mxu1 %v429_v22 }
  0x15   :  { %7 = vsyncpa [#allocation3], 0  ;;  %v437_v27 = vld [vmem:[%s609_s1 + $0xc0] ss:$16 sps:$4 sm:$0xff]   ;;  %v438_v28 = vld [vmem:[%s609_s1 + $0xc8] ss:$16 sps:$4 sm:$0xff]  }
  0x16   :  { %v439_v29 = vld [vmem:[%s609_s1 + $0xe4] ss:$16 sps:$4 sm:$0xff]   ;;  %v441_v30 = vld [vmem:[%s609_s1 + $0xec] ss:$16 sps:$4 sm:$0xff]   ;;  %v443_v31 = vld [vmem:[%s609_s1 + $0xe0] ss:$16 sps:$4 sm:$0xff]  }
  0x17   :  { %232 = vmatpush1.bf16.msra.mxu0 %v431_v23  ;;  %285 = vmatpush1.bf16.msra.mxu1 %v432_v24  ;;  %v444_v32 = vld [vmem:[%s609_s1 + $0xe8] ss:$16 sps:$4 sm:$0xff]   ;;  %v445_v33 = vld [vmem:[%s608_s0] sm:$0xff]   ;;  %s472_s1 = smov [#allocation2]  }
  0x18   :  { %233 = vmatprep.subr.bf16.mxu0 %v433_v25  ;;  %286 = vmatprep.subr.bf16.mxu1 %v435_v26  ;;  %v446_v34 = vld [vmem:[%s608_s0 + $0x8] sm:$0xff]   ;;  %s348_s0 = sshll.u32 %s472_s1, 4  ;;  %s349_s0 = int_to_ptr.vmem [resolvable:$true] %s348_s0 }
  0x19   :  { %s447_s21 = scalar_lea.vmem %s349_s0, 2048  ;;  %p452_p1 = scmp.lt.s32.totalorder %s349_s0, %s349_s0 }
  0x1a   :  { %p448_p0 = scmp.ne.s32.totalorder %s349_s0, %s447_s21  ;;  %p453_p2 = scmp.lt.s32.totalorder %s447_s21, %s447_s21 }
  0x1b   :  { %234 = vmatpush1.bf16.msra.mxu0 %v437_v27  ;;  %287 = vmatpush1.bf16.msra.mxu1 %v438_v28 }
  0x1c   :  { %235 = vmatprep.subr.bf16.mxu0 %v439_v29  ;;  %288 = vmatprep.subr.bf16.mxu1 %v441_v30  ;;  %p454_p3 = por %p453_p2, %p452_p1 }
  0x1e   :  { %p455_p4 = pnand %p454_p3, %p448_p0 }
  0x1f   :  { %236 = vmatpush1.bf16.msra.mxu0 %v443_v31  ;;  %289 = vmatpush1.bf16.msra.mxu1 %v444_v32 }
  0x22   :  { %254 = vmatmul.mubr.bf16.vlgmr.msra.gmra.mrb[0].mxu0 %v445_v33  ;;  %307 = vmatmul.mubr.bf16.vlgmr.msra.gmra.mrb[0].mxu1 %v445_v33 }
  0x23   :  { %263 = vmatprep.mubr.bf16.mxu0 %v471_v2  ;;  %316 = vmatprep.mubr.bf16.mxu1 %v471_v2 }
  0x2a   :  { %264 = vmatmul.mubr.bf16.gmra.mrb[4].mxu0 %v446_v34  ;;  %317 = vmatmul.mubr.bf16.gmra.mrb[4].mxu1 %v446_v34 }
  0xf5   :  { %v255_v35 = vpop.f32.mrb[0].mxu0  ;;  %v308_v36 = vpop.f32.mrb[0].mxu1 }
  0xf6   :  { %327 = vst [vmem:[#allocation2] sm:$0xff] %v255_v35  ;;  %329 = vst [vmem:[#allocation2 + $0x10] sm:$0xff] %v308_v36  ;;  %v257_v37 = vpop.f32.mrb[1].mxu0  ;;  %v310_v38 = vpop.f32.mrb[1].mxu1 }
  0xf7   :  { %328 = vst [vmem:[#allocation2 + $0x8] sm:$0xff] %v257_v37  ;;  %330 = vst [vmem:[#allocation2 + $0x18] sm:$0xff] %v310_v38  ;;  %v259_v39 = vpop.f32.mrb[2].mxu0  ;;  %v312_v40 = vpop.f32.mrb[2].mxu1 }
  0xf8   :  { %331 = vst [vmem:[#allocation2 + $0x20] sm:$0xff] %v259_v39  ;;  %333 = vst [vmem:[#allocation2 + $0x30] sm:$0xff] %v312_v40  ;;  %v261_v41 = vpop.f32.mrb[3].mxu0  ;;  %v314_v42 = vpop.f32.mrb[3].mxu1 }
  0xf9   :  { %332 = vst [vmem:[#allocation2 + $0x28] sm:$0xff] %v261_v41  ;;  %334 = vst [vmem:[#allocation2 + $0x38] sm:$0xff] %v314_v42 }
  0xfd   :  { %v265_v43 = vpop.f32.mrb[4].mxu0  ;;  %v318_v44 = vpop.f32.mrb[4].mxu1 }
  0xfe   :  { %335 = vst [vmem:[#allocation2 + $0x40] sm:$0xff] %v265_v43  ;;  %337 = vst [vmem:[#allocation2 + $0x50] sm:$0xff] %v318_v44  ;;  %v267_v45 = vpop.f32.mrb[5].mxu0  ;;  %v320_v46 = vpop.f32.mrb[5].mxu1 }
  0xff   :  { %336 = vst [vmem:[#allocation2 + $0x48] sm:$0xff] %v267_v45  ;;  %338 = vst [vmem:[#allocation2 + $0x58] sm:$0xff] %v320_v46  ;;  %v269_v47 = vpop.f32.mrb[6].mxu0  ;;  %v322_v48 = vpop.f32.mrb[6].mxu1 }
 0x100   :  { %339 = vst [vmem:[#allocation2 + $0x60] sm:$0xff] %v269_v47  ;;  %341 = vst [vmem:[#allocation2 + $0x70] sm:$0xff] %v322_v48  ;;  %v271_v49 = vpop.f32.mrb[7].mxu0  ;;  %v324_v50 = vpop.f32.mrb[7].mxu1 }
 0x101   :  { %340 = vst [vmem:[#allocation2 + $0x68] sm:$0xff] %v271_v49  ;;  %342 = vst [vmem:[#allocation2 + $0x78] sm:$0xff] %v324_v50 }
 0x102   :  { %458 = shalt.err (!%p455_p4)
}
 0x103   :  { %s459_s24 = scalar_lea.hbm %s610_s2, 2048 }
 0x104   :  { %p460_p5 = scmp.ne.s32.totalorder %s610_s2, %s459_s24  ;;  %p463_p6 = scmp.lt.u32.totalorder %s459_s24, %s610_s2 }
 0x106   :  { %p465_p7 = pnand %p463_p6, %p460_p5 }
 0x108   :  { %468 = shalt.err (!%p465_p7)
}
 0x109   :  { %s473_s29 = smov 512   ;;  %s474_s30 = smov 32  }
 0x10a   :  { %354 = dma.vmem_to_hbm [thread:$0]  %s349_s0, 2048, %s610_s2, [#allocation3], %s473_s29, %s473_s29, %s474_s30  }
 0x10b   :  { %469 = dma.done.wait [#allocation3], 2048  }
 0x10c   :  { %470 = vsyncadd [#allocation3], 4294965248 }
 0x10d   :  { %358 = vsyncpa [#allocation3], 1 }

// kernel: gpt_forward.2
= control target key start
LH: loop header
LB: loop body
LE: loop exit
PB: predicated region body
PF: predicated region fallthrough
CT: control target
= control target key end

     0   :  { %s5878_s0 = inlined_call_operand.vmem [shape: f32[32,128], index: 0, kind: input, shape index: {}]   ;;  %s5879_s1 = inlined_call_operand.vmem [shape: f32[16,16], index: 1, kind: input, shape index: {}]   ;;  %s5880_s2 = inlined_call_operand.hbm [shape: f32[1,128], index: 2, kind: input, shape index: {}]   ;;  %s5881_s3 = inlined_call_operand.hbm [shape: f32[1,128], index: 3, kind: input, shape index: {}]   ;;  %s5882_s4 = inlined_call_operand.vmem [shape: f32[2,1,128], index: 4, kind: input, shape index: {}]   ;;  %s5883_s5 = inlined_call_operand.vmem [shape: f32[2,1,128], index: 5, kind: input, shape index: {}]   ;;  %s5884_s6 = inlined_call_operand.hbm [shape: bf16[2,128,384], index: 6, kind: input, shape index: {}]   ;;  %s5885_s7 = inlined_call_operand.vmem [shape: f32[2,1,384], index: 7, kind: input, shape index: {}]   ;;  %s5886_s8 = inlined_call_operand.hbm [shape: bf16[2,128,128], index: 8, kind: input, shape index: {}]   ;;  %s5887_s9 = inlined_call_operand.vmem [shape: f32[2,1,128], index: 9, kind: input, shape index: {}]   ;;  %s5888_s10 = inlined_call_operand.vmem [shape: f32[2,1,128], index: 10, kind: input, shape index: {}]   ;;  %s5889_s11 = inlined_call_operand.vmem [shape: f32[2,1,128], index: 11, kind: input, shape index: {}]   ;;  %s5890_s12 = inlined_call_operand.vmem [shape: bf16[2,128,512], index: 12, kind: input, shape index: {}]   ;;  %s5891_s13 = inlined_call_operand.vmem [shape: f32[2,1,512], index: 13, kind: input, shape index: {}]   ;;  %s5892_s14 = inlined_call_operand.hbm [shape: bf16[2,512,128], index: 14, kind: input, shape index: {}]   ;;  %s5893_s15 = inlined_call_operand.vmem [shape: f32[2,1,128], index: 15, kind: input, shape index: {}]   ;;  %s5894_s16 = inlined_call_operand.vmem [shape: bf16[32,128], index: 16, kind: output, shape index: {}]  }
   0x1   :  { %5914 = sst [smem:[#allocation21_spill]] %s5878_s0 }
   0x2   :  { %5915 = sst [smem:[#allocation22_spill]] %s5879_s1 }
   0x3   :  { %5916 = sst [smem:[#allocation23_spill]] %s5880_s2 }
   0x4   :  { %5917 = sst [smem:[#allocation24_spill]] %s5881_s3 }
   0x5   :  { %5918 = sst [smem:[#allocation25_spill]] %s5884_s6 }
   0x6   :  { %5919 = sst [smem:[#allocation26_spill]] %s5885_s7 }
   0x7   :  { %5920 = sst [smem:[#allocation27_spill]] %s5886_s8 }
   0x8   :  { %5921 = sst [smem:[#allocation28_spill]] %s5887_s9 }
   0x9   :  { %5922 = sst [smem:[#allocation29_spill]] %s5888_s10 }
   0xa   :  { %5923 = sst [smem:[#allocation30_spill]] %s5889_s11 }
   0xb   :  { %5924 = sst [smem:[#allocation31_spill]] %s5890_s12 }
   0xc   :  { %5925 = sst [smem:[#allocation32_spill]] %s5891_s13 }
   0xd   :  { %5926 = sst [smem:[#allocation33_spill]] %s5892_s14 }
   0xe   :  { %5927 = sst [smem:[#allocation34_spill]] %s5893_s15 }
   0xf   :  { %5928 = sst [smem:[#allocation35_spill]] %s5894_s16 }
  0x10   :  { %21 = vsyncpa [#allocation4], 0 }
  0x11   :  { %22 = vsyncpa [#allocation6], 0  ;;  %s4937_s21 = smov 0   ;;  %s4939_s22 = smov 0  }
  0x12   :  { %s4941_s23 = smov 0   ;;  %s4943_s24 = smov 0  }
  0x13   :  { %s4945_s25 = smov 0   ;;  %s4947_s26 = smov 0  }
  0x14   :  { %s4949_s27 = smov 0   ;;  %s4951_s28 = smov 0  }
  0x15 LB: > { %5929 = sst [smem:[#allocation13_spill]] %s4809_s22  ;;  %s5895_s29 = sadd.s32 4294967295, %s4833_s28   ;;  %s4833_s28 = sphi %s4951_s28, %s28_s28   ;;  %s4829_s27 = sphi %s4949_s27, %s5985_s27   ;;  %s4825_s26 = sphi %s4947_s26, %s5984_s26   ;;  %s4821_s25 = sphi %s4945_s25, %s5983_s25   ;;  %s4817_s24 = sphi %s4943_s24, %s5982_s24   ;;  %s4813_s23 = sphi %s4941_s23, %s5981_s23   ;;  %s4809_s22 = sphi %s4939_s22, %s5980_s22   ;;  %s4805_s21 = sphi %s4937_s21, %s5979_s21  }
  0x16   : > { %5930 = sst [smem:[#allocation14_spill]] %s4813_s23  ;;  %p195_p0 = scmp.ne.s32.totalorder %s4813_s23, %s4809_s22 }
  0x17   : > { %5931 = sst [smem:[#allocation15_spill]] %s4825_s26  ;;  %p196_p1 = scmp.eq.s32.totalorder %s4833_s28, 0 }
  0x18   : > { %5932 = sst [smem:[#allocation16_spill]] %s4829_s27  ;;  %p201_p2 = scmp.ne.s32.totalorder %s4809_s22, %s4805_s21 }
  0x19   : > { %5933 = sst [smem:[#allocation17_spill]] %s4833_s28  ;;  %p4983_p3 = scmp.eq.s32.totalorder %s5895_s29, 0 }
  0x1a   : > { %p197_p4 = por %p196_p1, %p195_p0  ;;  %p3965_p5 = scmp.ge.s32.totalorder %s4833_s28, 1 }
  0x1b   : > { %s5934_s0 = scalar_select %p4983_p3, 1, 0 }
  0x1c   : > { %p4990_p6 = por %p4983_p3, %p201_p2  ;;  %p472_p7 = scmp.lt.s32.totalorder %s4833_s28, 5 }
  0x1d   : > { %s4835_s19 = smov [#allocation3]   ;;  %p4335_p10 = scmp.lt.s32.totalorder %s4833_s28, 4 }
  0x1e   : > { %s5935_s17 = scalar_select %p4990_p6, 1, 0 }
  0x1f   : > { %p4995_p8 = pnand %p3965_p5, %p472_p7  ;;  %s488_s20 = sshll.u32 %s4835_s19, 4  ;;  %s489_s20 = int_to_ptr.vmem [resolvable:$true] %s488_s20 }
  0x20   : > { %p5008_p12 = pnand %p4335_p10, %p197_p4  ;;  %s5939_s2 = sld [smem:[#allocation23_spill]] }
  0x21   : > { %s5936_s18 = scalar_select %p4995_p8, 1, 0 }
  0x22   : > { %p4316_p9 = pneg %p4995_p8 }
  0x23   : > { %s5938_s29 = scalar_select %p5008_p12, 1, 0 }
  0x24   : > { %p5004_p11 = pnand %p4316_p9, %p4983_p3 }
  0x26   : > { %s5937_s21 = scalar_select %p5004_p11, 1, 0 }
  0x27   : > { %s4613_s16 = scalar_lea.hbm %s5939_s2, 16  ;;  %p5904_p0 = pneg %p5004_p11 }
  0x28   : > { %p4614_p13 = scmp.ne.s32.totalorder %s5939_s2, %s4613_s16  ;;  %p4620_p4 = scmp.lt.u32.totalorder %s4613_s16, %s5939_s2 }
  0x2a   : > { %p4616_p1 = pnand %p5904_p0, %p4614_p13 }
  0x2c   : > { %p4617_p2 = pneg %p4616_p1 }
  0x2e   : > { %p4622_p5 = pnand %p4620_p4, %p4617_p2 }
  0x30   : > { %4625 = shalt.err (!%p4622_p5)
}
  0x31   : > { %s4626_s11 = scalar_lea.vmem %s489_s20, 16  ;;  %s4633_s1 = scalar_lea.vmem %s489_s20, 32 }
  0x32   : > { %p4627_p7 = scmp.ne.s32.totalorder %s489_s20, %s4626_s11  ;;  %p4634_p6 = scmp.lt.s32.totalorder %s489_s20, %s489_s20 }
  0x33   : > { %p4635_p3 = scmp.lt.s32.totalorder %s4633_s1, %s4626_s11 }
  0x34   : > { %p4629_p9 = pnand %p4627_p7, %p5904_p0 }
  0x35   : > { %p4636_p8 = por %p4635_p3, %p4634_p6 }
  0x36   : > { %p4630_p10 = pneg %p4629_p9 }
  0x38   : > { %p4637_p12 = pnand %p4636_p8, %p4630_p10 }
  0x3a   : > { %4640 = shalt.err (!%p4637_p12)
}
  0x3b   : > { %4319 = dma.hbm_to_vmem [thread:$0]  (!%p5004_p11), %s5939_s2, 16, %s489_s20, [#allocation4]  }
  0x3c   : > { %s37_s13 = sadd.s32 1, %s4825_s26  ;;  %s40_s11 = sadd.s32 1, %s4829_s27 }
  0x3d   : > { %p38_p3 = scmp.ge.s32.totalorder %s37_s13, 2  ;;  %s531_s16 = sand.u32 1, %s4833_s28  }
  0x3e   : > { %s5038_s30 = sand.u32 1, %s4813_s23   ;;  %s4299_s15 = smul.u32 3072, %s4825_s26 }
  0x3f   : > { %s5987_s13 = smov (%p38_p3, %s37_s13), 0  ;;  %s5989_s11 = smov (!%p38_p3, %s40_s11), %s4829_s27 }
  0x40   : > { %5940 = sst [smem:[#allocation18_spill]] %s5987_s13  ;;  %s185_s19 = ssub.s32 %s4825_s26, %s5987_s13 }
  0x41   : > { %s4298_s1 = smul.u32 192, %s5038_s30  ;;  %p42_p6 = scmp.ge.s32.totalorder %s5989_s11, 2 }
  0x42   : > { %p186_p8 = scmp.eq.s32.totalorder %s185_s19, 0  ;;  %s5942_s20 = sadd.s32 1, %s4813_s23 }
  0x43   : > { %s5991_s11 = smov (%p42_p6, %s5989_s11), 0  ;;  %s5944_s6 = sld [smem:[#allocation25_spill]] }
  0x44   : > { %5941 = sst [smem:[#allocation19_spill]] %s5991_s11  ;;  %s535_s27 = scalar_lea.vmem [#allocation7], %s4298_s1 }
  0x45   : > { %s5052_s12 = scalar_select %p186_p8, %s4813_s23, %s5942_s20  }
  0x46   : > { %s542_s13 = sshll.u32 %s535_s27, 4  ;;  %s5062_s9 = scalar_lea.sflag [#allocation4], %s531_s16  ;;  %s5059_s13 = int_to_ptr.vmem [resolvable:$true] %s542_s13 }
  0x47   : > { %5943 = sst [smem:[#allocation20_spill]] %s5052_s12  ;;  %p5945_p13 = scmp.ne.s32.totalorder %s5938_s29, 0 }
  0x49   : > { %s5057_s7 = scalar_lea.hbm %s5944_s6, %s4299_s15  ;;  %p5068_p1 = pneg %p5945_p13 }
  0x4a   : > { %s4641_s11 = scalar_lea.hbm %s5057_s7, 3072  ;;  %s4646_s27 = scalar_lea.hbm %s5944_s6, 6144 }
  0x4b   : > { %p4642_p12 = scmp.ne.s32.totalorder %s5057_s7, %s4641_s11  ;;  %p4647_p5 = scmp.lt.u32.totalorder %s5057_s7, %s5944_s6 }
  0x4c   : > { %s5946_s20 = scalar_select %p5068_p1, 1, 0 }
  0x4d   : > { %p4644_p2 = pnand %p5068_p1, %p4642_p12  ;;  %p4648_p7 = scmp.lt.u32.totalorder %s4646_s27, %s4641_s11 }
  0x4e   : > { %p4650_p10 = scmp.lt.u32.totalorder %s4641_s11, %s5057_s7 }
  0x4f   : > { %p4645_p4 = pneg %p4644_p2  ;;  %p4649_p9 = por %p4648_p7, %p4647_p5 }
  0x51   : > { %p4651_p3 = por %p4650_p10, %p4649_p9 }
  0x53   : > { %p4652_p6 = pnand %p4651_p3, %p4645_p4 }
  0x55   : > { %4655 = shalt.err (!%p4652_p6)
}
  0x56   : > { %s4656_s16 = scalar_lea.vmem %s5059_s13, 3072  ;;  %s4836_s2 = smov [#allocation7]  }
  0x57   : > { %p4657_p8 = scmp.ne.s32.totalorder %s5059_s13, %s4656_s16  ;;  %s4661_s10 = sshll.u32 %s4836_s2, 4  ;;  %s4662_s10 = int_to_ptr.vmem [resolvable:$false] %s4661_s10 }
  0x58   : > { %s4663_s1 = scalar_lea.vmem %s4662_s10, 6144  ;;  %p4664_p0 = scmp.lt.s32.totalorder %s5059_s13, %s4662_s10 }
  0x59   : > { %p4659_p12 = pnand %p4657_p8, %p5068_p1  ;;  %p4665_p11 = scmp.lt.s32.totalorder %s4663_s1, %s4656_s16 }
  0x5b   : > { %p4660_p2 = pneg %p4659_p12  ;;  %p4666_p5 = por %p4665_p11, %p4664_p0 }
  0x5d   : > { %p4667_p7 = pnand %p4666_p5, %p4660_p2 }
  0x5f   : > { %4670 = shalt.err (!%p4667_p7)
}
  0x60   : > { %s4837_s11 = smov 192   ;;  %s4838_s27 = smov 12  }
  0x61   : > { %4326 = dma.hbm_to_vmem [thread:$0]  (!%p5945_p13), %s5057_s7, 3072, %s5059_s13, %s5062_s9, %s4837_s11, %s4837_s11, %s4838_s27  }
  0x62   : > { %s4122_s15 = sshll.u32 %s4825_s26, 10  ;;  %s5947_s8 = sld [smem:[#allocation27_spill]] }
  0x63   : > { %s5948_s16 = sshll.u32 %s5038_s30, 6 }
  0x64   : > { %s563_s1 = scalar_lea.vmem [#allocation8], %s5948_s16 }
  0x65   : > { %s570_s6 = sshll.u32 %s563_s1, 4  ;;  %s5100_s6 = int_to_ptr.vmem [resolvable:$true] %s570_s6 }
  0x68   : > { %s5096_s10 = scalar_lea.hbm %s5947_s8, %s4122_s15  ;;  %s4676_s19 = scalar_lea.hbm %s5947_s8, 2048 }
  0x69   : > { %s4671_s12 = scalar_lea.hbm %s5096_s10, 1024  ;;  %p4677_p9 = scmp.lt.u32.totalorder %s5096_s10, %s5947_s8 }
  0x6a   : > { %p4672_p11 = scmp.ne.s32.totalorder %s5096_s10, %s4671_s12  ;;  %p4678_p10 = scmp.lt.u32.totalorder %s4676_s19, %s4671_s12 }
  0x6b   : > { %p4680_p6 = scmp.lt.u32.totalorder %s4671_s12, %s5096_s10 }
  0x6c   : > { %p4674_p0 = pnand %p4672_p11, %p5068_p1  ;;  %p4679_p3 = por %p4678_p10, %p4677_p9 }
  0x6e   : > { %p4675_p4 = pneg %p4674_p0  ;;  %p4681_p8 = por %p4680_p6, %p4679_p3 }
  0x70   : > { %p4682_p12 = pnand %p4681_p8, %p4675_p4 }
  0x72   : > { %4685 = shalt.err (!%p4682_p12)
}
  0x73   : > { %s4686_s15 = scalar_lea.vmem %s5100_s6, 1024  ;;  %s4839_s2 = smov [#allocation8]  }
  0x74   : > { %p4687_p2 = scmp.ne.s32.totalorder %s5100_s6, %s4686_s15  ;;  %s4691_s16 = sshll.u32 %s4839_s2, 4  ;;  %s4692_s16 = int_to_ptr.vmem [resolvable:$false] %s4691_s16 }
  0x75   : > { %s4693_s1 = scalar_lea.vmem %s4692_s16, 2048  ;;  %p4694_p11 = scmp.lt.s32.totalorder %s5100_s6, %s4692_s16 }
  0x76   : > { %p4689_p5 = pnand %p4687_p2, %p5068_p1  ;;  %p4695_p0 = scmp.lt.s32.totalorder %s4693_s1, %s4686_s15 }
  0x78   : > { %p4690_p7 = pneg %p4689_p5  ;;  %p4696_p9 = por %p4695_p0, %p4694_p11 }
  0x7a   : > { %p4697_p10 = pnand %p4696_p9, %p4690_p7 }
  0x7c   : > { %4700 = shalt.err (!%p4697_p10)
}
  0x7d   : > { %s4840_s12 = smov 64   ;;  %s4841_s7 = smov 4  }
  0x7e   : > { %4329 = dma.hbm_to_vmem [thread:$0]  (!%p5945_p13), %s5096_s10, 1024, %s5100_s6, %s5062_s9, %s4840_s12, %s4840_s12, %s4841_s7  }
  0x7f   : > { %s4842_s13 = smov [#allocation5]   ;;  %s3973_s11 = sshll.u32 %s5038_s30, 8 }
  0x80   : > { %s499_s19 = sshll.u32 %s4842_s13, 4  ;;  %s5949_s3 = sld [smem:[#allocation24_spill]]  ;;  %s500_s19 = int_to_ptr.vmem [resolvable:$true] %s499_s19 }
  0x81   : > { %p5950_p3 = scmp.ne.s32.totalorder %s5937_s21, 0 }
  0x83   : > { %p5951_p6 = pneg %p5950_p3 }
  0x86   : > { %s4701_s2 = scalar_lea.hbm %s5949_s3, 16 }
  0x87   : > { %p4702_p4 = scmp.ne.s32.totalorder %s5949_s3, %s4701_s2  ;;  %p4708_p2 = scmp.lt.u32.totalorder %s4701_s2, %s5949_s3 }
  0x89   : > { %p4704_p8 = pnand %p4702_p4, %p5951_p6 }
  0x8b   : > { %p4705_p12 = pneg %p4704_p8 }
  0x8d   : > { %p4710_p5 = pnand %p4708_p2, %p4705_p12 }
  0x8f   : > { %4713 = shalt.err (!%p4710_p5)
}
  0x90   : > { %s4714_s6 = scalar_lea.vmem %s500_s19, 16  ;;  %p5952_p11 = pmov %p5951_p6 }
  0x91   : > { %p4715_p7 = scmp.ne.s32.totalorder %s500_s19, %s4714_s6  ;;  %s4721_s30 = scalar_lea.vmem %s500_s19, 32 }
  0x92   : > { %p4722_p10 = scmp.lt.s32.totalorder %s500_s19, %s500_s19  ;;  %p4723_p13 = scmp.lt.s32.totalorder %s4721_s30, %s4714_s6 }
  0x93   : > { %p4717_p0 = pnand %p4715_p7, %p5952_p11 }
  0x94   : > { %p4724_p1 = por %p4723_p13, %p4722_p10 }
  0x95   : > { %p4718_p9 = pneg %p4717_p0 }
  0x97   : > { %p4725_p4 = pnand %p4724_p1, %p4718_p9 }
  0x99   : > { %4728 = shalt.err (!%p4725_p4)
}
  0x9a   : > { %4322 = dma.hbm_to_vmem [thread:$0]  (!%p5950_p3), %s5949_s3, 16, %s500_s19, [#allocation6]  }
  0x9b   : > { %s4123_s23 = sshll.u32 %s4825_s26, 12  ;;  %s617_s13 = scalar_lea.vmem [#allocation9], %s3973_s11 }
  0x9c   : > { %s624_s27 = sshll.u32 %s617_s13, 4  ;;  %s5953_s14 = sld [smem:[#allocation33_spill]]  ;;  %s5154_s27 = int_to_ptr.vmem [resolvable:$true] %s624_s27 }
  0x9d   : > { %p5954_p1 = scmp.ne.s32.totalorder %s5946_s20, 0 }
  0xa2   : > { %s5152_s16 = scalar_lea.hbm %s5953_s14, %s4123_s23  ;;  %s4734_s11 = scalar_lea.hbm %s5953_s14, 8192 }
  0xa3   : > { %s4729_s21 = scalar_lea.hbm %s5152_s16, 4096  ;;  %p4735_p3 = scmp.lt.u32.totalorder %s5152_s16, %s5953_s14 }
  0xa4   : > { %p4730_p13 = scmp.ne.s32.totalorder %s5152_s16, %s4729_s21  ;;  %p4736_p12 = scmp.lt.u32.totalorder %s4734_s11, %s4729_s21 }
  0xa5   : > { %p4738_p5 = scmp.lt.u32.totalorder %s4729_s21, %s5152_s16 }
  0xa6   : > { %p4732_p6 = pnand %p4730_p13, %p5954_p1  ;;  %p4737_p2 = por %p4736_p12, %p4735_p3 }
  0xa8   : > { %p4733_p8 = pneg %p4732_p6  ;;  %p4739_p7 = por %p4738_p5, %p4737_p2 }
  0xaa   : > { %p4740_p11 = pnand %p4739_p7, %p4733_p8 }
  0xac   : > { %4743 = shalt.err (!%p4740_p11)
}
  0xad   : > { %s4744_s10 = scalar_lea.vmem %s5154_s27, 4096  ;;  %s4843_s8 = smov [#allocation9]  }
  0xae   : > { %p4745_p0 = scmp.ne.s32.totalorder %s5154_s27, %s4744_s10  ;;  %s4749_s23 = sshll.u32 %s4843_s8, 4  ;;  %s4750_s23 = int_to_ptr.vmem [resolvable:$false] %s4749_s23 }
  0xaf   : > { %s4751_s13 = scalar_lea.vmem %s4750_s23, 8192  ;;  %p4752_p4 = scmp.lt.s32.totalorder %s5154_s27, %s4750_s23 }
  0xb0   : > { %p4747_p9 = pnand %p4745_p0, %p5954_p1  ;;  %p4753_p13 = scmp.lt.s32.totalorder %s4751_s13, %s4744_s10 }
  0xb2   : > { %p4748_p10 = pneg %p4747_p9  ;;  %p4754_p6 = por %p4753_p13, %p4752_p4 }
  0xb4   : > { %p4755_p3 = pnand %p4754_p6, %p4748_p10 }
  0xb6   : > { %4758 = shalt.err (!%p4755_p3)
}
  0xb7   : > { %p5955_p8 = scmp.ne.s32.totalorder %s5938_s29, 0  ;;  %p5956_p1 = scmp.ne.s32.totalorder %s5936_s18, 0 }
  0xb8   : > { %p5957_p12 = scmp.ne.s32.totalorder (!%p5956_p1), %s5934_s0, 0 }
  0xb9   : > { %4332 = dma.hbm_to_vmem [thread:$0]  (!%p5955_p8), %s5152_s16, 4096, %s5154_s27, %s5062_s9, %s4840_s12, %s4840_s12, %s4841_s7  }
  0xba   : > { %642 = sbr.rel (%p5956_p1) target bundleno = 3210 (0xc8a), region = 84 }
  0xc1   : > { %4792 = dma.done.wait (%p5957_p12), [#allocation4], 16  }
  0xc2   : > { %4794 = vsyncadd (%p5957_p12), [#allocation4], 4294967280 }
  0xc3   : > { %4796 = dma.done.wait (%p5957_p12), [#allocation6], 16  }
  0xc4   : > { %4798 = vsyncadd (%p5957_p12), [#allocation6], 4294967280  ;;  %s5958_s29 = sadd.s32 4294967295, %s4833_s28   ;;  %s5194_s20 = sand.u32 1, %s4809_s22  }
  0xc5   : > { %s652_s9 = sand.u32 1, %s5958_s29   ;;  %s4300_s18 = smul.u32 192, %s5194_s20 }
  0xc6   : > { %s653_s12 = scalar_lea.sflag [#allocation4], %s652_s9  ;;  %p5959_p2 = scmp.ne.s32.totalorder %s5935_s17, 0 }
  0xc7   : > { %s5197_s7 = scalar_lea.vmem [#allocation7], %s4300_s18 }
  0xc8   : > { %4800 = dma.done.wait (%p5959_p2), %s653_s12, 8192  }
  0xc9   : > { %4802 = vsyncadd (%p5959_p2), %s653_s12, 4294959104  ;;  %s3979_s0 = sshll.u32 %s5194_s20, 6  ;;  %s3980_s27 = sshll.u32 %s5194_s20, 8 }
  0xca   : > { %s3981_s15 = sshll.u32 %s4821_s25, 1  ;;  %p775_p5 = scmp.lt.s32.totalorder %s4817_s24, 1 }
  0xcb   : > { %p770_p7 = scmp.lt.s32.totalorder %s3981_s15, 3  ;;  %s5960_s8 = sld [smem:[#allocation21_spill]] }
  0xcc   : > { %s5208_s2 = scalar_select %p775_p5, %s4817_s24, 1 }
  0xcd   : > { %s5993_s15 = smov (!%p770_p7, %s3981_s15), 3  ;;  %s5961_s9 = sld [smem:[#allocation28_spill]] }
  0xce   : > { %s3982_s11 = sshll.u32 %s5993_s15, 3  ;;  %s4301_s6 = smul.u32 3, %s5208_s2 }
  0xcf   : > { %s5962_s3 = sld [smem:[#allocation26_spill]]  ;;  %s4124_s28 = sshll.u32 %s5208_s2, 8 }
  0xd0   : > { %s5965_s10 = sld [smem:[#allocation31_spill]]  ;;  %s3985_s13 = sshll.u32 %s5208_s2, 2 }
  0xd1   : > { %s773_s23 = scalar_lea.vmem %s5960_s8, %s3982_s11  ;;  %s5966_s18 = sld [smem:[#allocation32_spill]] }
  0xd2   : > { %s5967_s17 = sld [smem:[#allocation34_spill]]  ;;  %s3987_s16 = sshll.u32 %s5993_s15, 2 }
  0xd3   : > { %s787_s20 = scalar_lea.vmem %s5961_s9, %s5208_s2  ;;  %s5968_s26 = sld [smem:[#allocation35_spill]] }
  0xd4   : > { %s5260_s22 = scalar_lea.vmem [#allocation8], %s3979_s0  ;;  %p3988_p11 = scmp.ne.s32.totalorder %s4817_s24, 0 }
  0xd5   : > { %s5229_s14 = scalar_lea.vmem %s5962_s3, %s4301_s6  ;;  %v817_v0 = vld [vmem:[%s773_s23] sm:$0xff] (!%p3988_p11)  ;;  %v818_v1 = vld [vmem:[%s773_s23 + $0x8] sm:$0xff] (!%p3988_p11) }
  0xd6   : > { %s5243_s8 = scalar_lea.vmem %s5965_s10, %s4124_s28  ;;  %s5262_s28 = scalar_lea.vmem [#allocation9], %s3980_s27  ;;  %819 = vst [vmem:[#allocation2] sm:$0xff] (!%p3988_p11), %v817_v0  ;;  %820 = vst [vmem:[#allocation2 + $0x8] sm:$0xff] (!%p3988_p11), %v818_v1 }
  0xd7   : > { %s5249_s3 = scalar_lea.vmem %s5966_s18, %s3985_s13  ;;  %816 = sbr.rel (%p3988_p11) target bundleno = 222 (0xde), region = 108 }
  0xd8   : > { %s805_s21 = scalar_lea.vmem %s5967_s17, %s5208_s2 }
  0xd9   : > { %s5258_s25 = scalar_lea.vmem %s5968_s26, %s3987_s16 }
  0xde PF: > { %v821_v2 = vld [vmem:[#allocation2] sm:$0xff]  ;;  %v822_v3 = vld [vmem:[#allocation2 + $0x8] sm:$0xff]  ;;  %v4844_v6 = vmov 0.0   ;;  %v4435_v8 = vld [vmem:[%s5197_s7 + $0x1c] ss:$12 sps:$4 sm:$0xff]   ;;  %v4845_v32 = vmov 0   ;;  %s5969_s27 = scalar_lea.vmem %s5882_s4, %s5208_s2  ;;  %s5970_s19 = scalar_lea.vmem %s5883_s5, %s5208_s2  ;;  %v899_v55 = vlaneseq }
  0xdf   : > { %825 = vadd.xlane.f32.xlu0 %v821_v2  ;;  %v4431_v4 = vld [vmem:[%s5197_s7 + $0x4] ss:$12 sps:$4 sm:$0xff]   ;;  %v4433_v5 = vld [vmem:[%s5197_s7] ss:$12 sps:$4 sm:$0xff]   ;;  %4210 = vmatprep.subr.bf16.mxu1 %v4844_v6  ;;  %v4434_v7 = vld [vmem:[%s5197_s7 + $0x8] ss:$12 sps:$4 sm:$0xff]  }
  0xe0   : > { %1042 = vmatprep.subr.bf16.mxu0 %v4431_v4  ;;  %4211 = vmatpush3.bf16.msra.mxu1 %v4434_v7  ;;  %v4437_v17 = vld [vmem:[%s5197_s7 + $0x18] ss:$12 sps:$4 sm:$0xff]   ;;  %v4438_v18 = vld [vmem:[%s5197_s7 + $0x20] ss:$12 sps:$4 sm:$0xff]   ;;  %v4441_v20 = vld [vmem:[%s5197_s7 + $0x30] ss:$12 sps:$4 sm:$0xff]  }
  0xe1   : > { %1043 = vmatpush1.bf16.msra.mxu0 %v4433_v5  ;;  %4212 = vmatprep.subr.bf16.mxu1 %v4844_v6  ;;  %v4439_v19 = vld [vmem:[%s5197_s7 + $0x34] ss:$12 sps:$4 sm:$0xff]   ;;  %v4442_v21 = vld [vmem:[%s5197_s7 + $0x38] ss:$12 sps:$4 sm:$0xff]   ;;  %v4446_v24 = vld [vmem:[%s5197_s7 + $0x50] ss:$12 sps:$4 sm:$0xff]  }
  0xe2   : > { %1044 = vmatprep.subr.bf16.mxu0 %v4435_v8  ;;  %v4443_v22 = vld [vmem:[%s5197_s7 + $0x4c] ss:$12 sps:$4 sm:$0xff]   ;;  %v4445_v23 = vld [vmem:[%s5197_s7 + $0x48] ss:$12 sps:$4 sm:$0xff]   ;;  %v4447_v25 = vld [vmem:[%s5197_s7 + $0x64] ss:$12 sps:$4 sm:$0xff]   ;;  %1074 = vmatprep.mubr.bf16.mxu0 %v4845_v32 }
  0xe3   : > { %827 = vadd.xlane.f32.xlu0 %v822_v3  ;;  %v4449_v26 = vld [vmem:[%s5197_s7 + $0x60] ss:$12 sps:$4 sm:$0xff]   ;;  %v4450_v27 = vld [vmem:[%s5197_s7 + $0x68] ss:$12 sps:$4 sm:$0xff]   ;;  %v4453_v29 = vld [vmem:[%s5197_s7 + $0x78] ss:$12 sps:$4 sm:$0xff]  }
  0xe4   : > { %4213 = vmatpush3.bf16.msra.mxu1 %v4438_v18  ;;  %v4451_v28 = vld [vmem:[%s5197_s7 + $0x7c] ss:$12 sps:$4 sm:$0xff]   ;;  %v4454_v30 = vld [vmem:[%s5197_s7 + $0x80] ss:$12 sps:$4 sm:$0xff]   ;;  %vm4846_vm0 = vmmov 0   ;;  %v5326_v56 = vshrl.u32 %v899_v55, 7 }
  0xe5   : > { %1045 = vmatpush1.bf16.msra.mxu0 %v4437_v17  ;;  %4214 = vmatprep.subr.bf16.mxu1 %v4844_v6  ;;  %v4455_v31 = vld [vmem:[%s5197_s7 + $0x94] ss:$12 sps:$4 sm:$0xff]   ;;  %v4457_v33 = vld [vmem:[%s5197_s7 + $0x90] ss:$12 sps:$4 sm:$0xff]   ;;  %v4458_v34 = vld [vmem:[%s5197_s7 + $0x98] ss:$12 sps:$4 sm:$0xff]  }
  0xe6   : > { %1046 = vmatprep.subr.bf16.mxu0 %v4439_v19  ;;  %4226 = vmatprep.mubr.msk.bf16.mxu1 %vm4846_vm0, %v4844_v6  ;;  %v4459_v35 = vld [vmem:[%s5197_s7 + $0xac] ss:$12 sps:$4 sm:$0xff]   ;;  %v4461_v36 = vld [vmem:[%s5197_s7 + $0xa8] ss:$12 sps:$4 sm:$0xff]   ;;  %v4462_v37 = vld [vmem:[%s5197_s7 + $0xb0] ss:$12 sps:$4 sm:$0xff]  }
  0xe7   : > { %v3989_v46 = vld [vmem:[%s5969_s27] ss:$0 sm:$0xff]  ;;  %v901_v57 = vsub.s32 0, %v5326_v56  ;;  %v905_v59 = vsub.s32 1, %v5326_v56  ;;  %s4848_s30 = smov 64   ;;  %s4849_s11 = smov 32  }
  0xe8   : > { %4215 = vmatpush3.bf16.msra.mxu1 %v4442_v21  ;;  %v3990_v50 = vld [vmem:[%s5970_s19] ss:$0 sm:$0xff]  ;;  %vm2024_vm1 = vcmask 261120   ;;  %s5971_s29 = sld [smem:[#allocation22_spill]]  ;;  %vm2213_vm2 = vcmask 130048   ;;  %vm2780_vm3 = vcmask 523264  }
  0xe9   : > { %1047 = vmatpush1.bf16.msra.mxu0 %v4441_v20  ;;  %4216 = vmatprep.subr.bf16.mxu1 %v4844_v6  ;;  %v5330_v58 = vld [vmem:[%s5229_s14] sm:$0x7]  ;;  %s4847_s14 = smov 96   ;;  %vm2783_vm4 = vcmask 785408   ;;  %s5973_s17 = sld [smem:[#allocation29_spill]] }
  0xea   : > { %1048 = vmatprep.subr.bf16.mxu0 %v4443_v22  ;;  %v902_v60 = vrot.slane %v5330_v58, %v901_v57  ;;  %v906_v61 = vrot.slane %v5330_v58, %v905_v59  ;;  %s5975_s7 = sld [smem:[#allocation30_spill]]  ;;  %p4115_p0 = scmp.ne.s32.totalorder %s4817_s24, 1 }
  0xec   : > { %4217 = vmatpush3.bf16.msra.mxu1 %v4446_v24 }
  0xed   : > { %1049 = vmatpush1.bf16.msra.mxu0 %v4445_v23  ;;  %4218 = vmatprep.subr.bf16.mxu1 %v4844_v6 }
  0xee   : > { %1050 = vmatprep.subr.bf16.mxu0 %v4447_v25 }
  0xef   : > { %s5974_s16 = scalar_lea.vmem %s5973_s17, %s5208_s2 }
  0xf0   : > { %4219 = vmatpush3.bf16.msra.mxu1 %v4450_v27  ;;  %s5976_s0 = scalar_lea.vmem %s5975_s7, %s5208_s2 }
  0xf1   : > { %1051 = vmatpush1.bf16.msra.mxu0 %v4449_v26  ;;  %4220 = vmatprep.subr.bf16.mxu1 %v4844_v6 }
  0xf2   : > { %1052 = vmatprep.subr.bf16.mxu0 %v4451_v28 }
  0xf4   : > { %4221 = vmatpush3.bf16.msra.mxu1 %v4454_v30 }
  0xf5   : > { %1053 = vmatpush1.bf16.msra.mxu0 %v4453_v29  ;;  %4222 = vmatprep.subr.bf16.mxu1 %v4844_v6 }
  0xf6   : > { %1054 = vmatprep.subr.bf16.mxu0 %v4455_v31 }
  0xf8   : > { %4223 = vmatpush3.bf16.msra.mxu1 %v4458_v34 }
  0xf9   : > { %1055 = vmatpush1.bf16.msra.mxu0 %v4457_v33  ;;  %4224 = vmatprep.subr.bf16.mxu1 %v4844_v6 }
  0xfa   : > { %1056 = vmatprep.subr.bf16.mxu0 %v4459_v35 }
  0xfc   : > { %4225 = vmatpush3.bf16.msra.mxu1 %v4462_v37 }
  0xfd   : > { %1057 = vmatpush1.bf16.msra.mxu0 %v4461_v36  ;;  %4230 = vmatprep.subr.bf16.mxu1 %v4844_v6 }
  0xfe   : > { %4254 = vmatprep.subr.bf16.mxu0 %v4844_v6 }
 0x16c   : > { %v826_v9 = vpop.xlane.xlu0 %825 }
 0x16d   : > { %v830_v10 = vmul.f32 0.0078125, %v826_v9 }
 0x16f   : > { %v5271_v11 = vsub.f32 %v821_v2, %v830_v10 }
 0x170   : > { %v828_v12 = vpop.xlane.xlu0 %827 }
 0x171   : > { %v831_v13 = vmul.f32 0.0078125, %v828_v12  ;;  %v834_v14 = vmul.f32 %v5271_v11, %v5271_v11 }
 0x173   : > { %v5275_v15 = vsub.f32 %v822_v3, %v831_v13  ;;  %836 = vadd.xlane.f32.xlu1 %v834_v14 }
 0x175   : > { %v835_v16 = vmul.f32 %v5275_v15, %v5275_v15 }
 0x177   : > { %838 = vadd.xlane.f32.xlu1 %v835_v16 }
 0x200   : > { %v837_v38 = vpop.xlane.xlu1 %836 }
 0x201   : > { %v840_v39 = vmul.f32 0.0078125, %v837_v38 }
 0x203   : > { %v842_v40 = vadd.f32 1e-05, %v840_v39 }
 0x204   : > { %v839_v41 = vpop.xlane.xlu1 %838 }
 0x205   : > { %4551 = vrsqrt.f32 %v842_v40  ;;  %v841_v42 = vmul.f32 0.0078125, %v839_v41 }
 0x207   : > { %v843_v43 = vadd.f32 1e-05, %v841_v42 }
 0x209   : > { %4553 = vrsqrt.f32 %v843_v43 }
 0x20f   : > { %v4552_v44 = vpop.eup %4551 }
 0x210   : > { %v846_v45 = vmul.f32 %v4552_v44, %v5271_v11  ;;  %v4850_v11 = vmov 1983009808  }
 0x211   : > { %v1149_v12 = vunpack.c.l.s4 %v4850_v11 }
 0x212   : > { %v854_v49 = vmul.f32 %v3989_v46, %v846_v45 }
 0x213   : > { %v4554_v47 = vpop.eup %4553  ;;  %v1150_v17 = vunpack.c.0.s8 %v1149_v12 }
 0x214   : > { %v847_v48 = vmul.f32 %v4554_v47, %v5275_v15  ;;  %v862_v52 = vadd.f32 %v3990_v50, %v854_v49  ;;  %v4851_v15 = vmov 1934713408  }
 0x215   : > { %v1181_v16 = vunpack.c.l.s4 %v4851_v15  ;;  %v5368_v21 = vsub.s32 %v1150_v17, %v5326_v56 }
 0x216   : > { %v855_v51 = vmul.f32 %v3989_v46, %v847_v48 }
 0x217   : > { %v1182_v20 = vunpack.c.0.s8 %v1181_v16 }
 0x218   : > { %v863_v53 = vadd.f32 %v3990_v50, %v855_v51 }
 0x219   : > { %v5371_v28 = vsub.s32 %v1182_v20, %v5326_v56 }
 0x21a   : > { %v864_v54 = vpack.c.bf16 %v863_v53, %v862_v52 }
 0x21c   : > { %1075 = vmatmul.mubr.bf16.vlgmr.msra.gmra.mrb[0].mxu0 %v864_v54  ;;  %4227 = vmatmul.mubr.bf16.vlgmr.msra.gmra.mrb[0].mxu1 %v864_v54 }
 0x21d   : > { %4232 = vmatprep.mubr.msk.bf16.mxu1 %vm4846_vm0, %v4844_v6  ;;  %4256 = vmatprep.mubr.msk.bf16.mxu0 %vm4846_vm0, %v4844_v6 }
 0x2ef   : > { %v1076_v62 = vpop.f32.mrb[0].mxu0  ;;  %v5339_v63 = vpop.f32.mrb[0].mxu1 }
 0x2f0   : > { %v5341_v0 = vadd.f32 %v1076_v62, %v902_v60  ;;  %v1078_v1 = vpop.f32.mrb[1].mxu0  ;;  %v4228_v2 = vpop.f32.mrb[1].mxu1 }
 0x2f1   : > { %v1079_v3 = vadd.f32 %v1078_v1, %v906_v61  ;;  %v1080_v4 = vpop.f32.mrb[2].mxu0  ;;  %v5343_v5 = vpop.f32.mrb[2].mxu1 }
 0x2f2   : > { %v1082_v7 = vpop.f32.mrb[3].mxu0  ;;  %v4229_v8 = vpop.f32.mrb[3].mxu1  ;;  %1128 = vrot.lane.b32.xlu0 %v5341_v0, %s4847_s14  ;;  %v5348_v9 = vadd.f32 %v1080_v4, %v902_v60 }
 0x2f3   : > { %1438 = vrot.lane.b32.xlu1 %v1079_v3, %s4848_s30  ;;  %v1083_v10 = vadd.f32 %v1082_v7, %v906_v61 }
 0x2f6   : > { %1432 = vrot.lane.b32.xlu0 %v1079_v3, %s4847_s14 }
 0x2f7   : > { %1130 = vrot.lane.b32.xlu1 %v5348_v9, %s4847_s14 }
 0x2fa   : > { %1444 = vrot.lane.b32.xlu0 %v1079_v3, %s4849_s11 }
 0x2fb   : > { %1434 = vrot.lane.b32.xlu1 %v1083_v10, %s4847_s14 }
 0x2fe   : > { %1134 = vrot.lane.b32.xlu0 %v5341_v0, %s4848_s30 }
 0x2ff   : > { %1440 = vrot.lane.b32.xlu1 %v1083_v10, %s4848_s30 }
 0x302   : > { %1140 = vrot.lane.b32.xlu0 %v5341_v0, %s4849_s11 }
 0x303   : > { %1446 = vrot.lane.b32.xlu1 %v1083_v10, %s4849_s11 }
 0x307   : > { %1136 = vrot.lane.b32.xlu1 %v5348_v9, %s4848_s30 }
 0x30b   : > { %1142 = vrot.lane.b32.xlu1 %v5348_v9, %s4849_s11 }
 0x364   : > { %v1129_v13 = vpop.permute.xlu0 %1128 }
 0x365   : > { %v1439_v14 = vpop.permute.xlu1 %1438 }
 0x366   : > { %v1450_v22 = vcombine.low %v1079_v3, %v1439_v14  ;;  %v1451_v23 = vcombine.high %v1079_v3, %v1439_v14 }
 0x368   : > { %v1433_v18 = vpop.permute.xlu0 %1432  ;;  %v1458_v29 = vrot.slane %v1450_v22, %v5368_v21  ;;  %v1465_v30 = vrot.slane %v1451_v23, %v5368_v21 }
 0x369   : > { %v5365_v19 = vpop.permute.xlu1 %1130 }
 0x36c   : > { %v1445_v24 = vpop.permute.xlu0 %1444 }
 0x36d   : > { %v1466_v25 = vcombine.low %v1433_v18, %v1445_v24  ;;  %v1467_v26 = vcombine.high %v1433_v18, %v1445_v24  ;;  %v1435_v27 = vpop.permute.xlu1 %1434 }
 0x36f   : > { %v1474_v31 = vrot.slane %v1466_v25, %v5368_v21  ;;  %v1481_v33 = vrot.slane %v1467_v26, %v5368_v21 }
 0x370   : > { %v1135_v34 = vpop.permute.xlu0 %1134 }
 0x371   : > { %v1482_v35 = vcombine.low %v1458_v29, %v1474_v31  ;;  %v1483_v36 = vcombine.high %v1458_v29, %v1474_v31  ;;  %v1498_v37 = vcombine.low %v1465_v30, %v1481_v33  ;;  %v1499_v38 = vcombine.high %v1465_v30, %v1481_v33  ;;  %v1441_v39 = vpop.permute.xlu1 %1440 }
 0x372   : > { %v1146_v40 = vcombine.low %v5341_v0, %v1135_v34  ;;  %v1147_v41 = vcombine.high %v5341_v0, %v1135_v34  ;;  %v1518_v42 = vcombine.low %v1083_v10, %v1441_v39  ;;  %v1519_v43 = vcombine.high %v1083_v10, %v1441_v39 }
 0x373   : > { %v1490_v44 = vrot.slane %v1482_v35, %v5371_v28  ;;  %v1497_v45 = vrot.slane %v1483_v36, %v5371_v28  ;;  %v1506_v46 = vrot.slane %v1498_v37, %v5371_v28  ;;  %v1513_v47 = vrot.slane %v1499_v38, %v5371_v28 }
 0x374   : > { %v1141_v48 = vpop.permute.xlu0 %1140  ;;  %v1154_v62 = vrot.slane %v1146_v40, %v5368_v21  ;;  %v1161_v0 = vrot.slane %v1147_v41, %v5368_v21  ;;  %v1526_v1 = vrot.slane %v1518_v42, %v5368_v21  ;;  %v1533_v2 = vrot.slane %v1519_v43, %v5368_v21 }
 0x375   : > { %v1586_v49 = vcombine.low %v1490_v44, %v1497_v45  ;;  %v4019_v50 = vcombine.high %v1490_v44, %v1497_v45  ;;  %v1602_v51 = vcombine.low %v1506_v46, %v1513_v47  ;;  %v4020_v52 = vcombine.high %v1506_v46, %v1513_v47  ;;  %v1447_v53 = vpop.permute.xlu1 %1446 }
 0x376   : > { %v1162_v54 = vcombine.low %v1129_v13, %v1141_v48  ;;  %v1163_v55 = vcombine.high %v1129_v13, %v1141_v48  ;;  %v1534_v60 = vcombine.low %v1435_v27, %v1447_v53  ;;  %v1535_v61 = vcombine.high %v1435_v27, %v1447_v53 }
 0x377   : > { %v5392_v10 = vrot.slane %v1586_v49, %v5368_v21  ;;  %v5395_v11 = vrot.slane %v4019_v50, %v5368_v21  ;;  %v5398_v12 = vrot.slane %v1602_v51, %v5368_v21  ;;  %v5401_v13 = vrot.slane %v4020_v52, %v5368_v21 }
 0x378   : > { %v1170_v3 = vrot.slane %v1162_v54, %v5368_v21  ;;  %v1177_v4 = vrot.slane %v1163_v55, %v5368_v21  ;;  %v1542_v7 = vrot.slane %v1534_v60, %v5368_v21  ;;  %v1549_v8 = vrot.slane %v1535_v61, %v5368_v21 }
 0x379   : > { %v1137_v18 = vpop.permute.xlu1 %1136  ;;  %v1618_v44 = vcombine.low %v5392_v10, %v5395_v11  ;;  %v1634_v45 = vcombine.low %v5398_v12, %v5401_v13 }
 0x37a   : > { %v1178_v14 = vcombine.low %v1154_v62, %v1170_v3  ;;  %v1179_v15 = vcombine.high %v1154_v62, %v1170_v3  ;;  %v1194_v16 = vcombine.low %v1161_v0, %v1177_v4  ;;  %v1195_v17 = vcombine.high %v1161_v0, %v1177_v4 }
 0x37b   : > { %v1550_v20 = vcombine.low %v1526_v1, %v1542_v7  ;;  %v1551_v22 = vcombine.high %v1526_v1, %v1542_v7  ;;  %v1566_v23 = vcombine.low %v1533_v2, %v1549_v8  ;;  %v1567_v24 = vcombine.high %v1533_v2, %v1549_v8 }
 0x37c   : > { %v1186_v25 = vrot.slane %v1178_v14, %v5371_v28  ;;  %v1193_v26 = vrot.slane %v1179_v15, %v5371_v28  ;;  %v1202_v27 = vrot.slane %v1194_v16, %v5371_v28  ;;  %v1209_v29 = vrot.slane %v1195_v17, %v5371_v28 }
 0x37d   : > { %v1558_v30 = vrot.slane %v1550_v20, %v5371_v28  ;;  %v1565_v31 = vrot.slane %v1551_v22, %v5371_v28  ;;  %v1574_v33 = vrot.slane %v1566_v23, %v5371_v28  ;;  %v1581_v34 = vrot.slane %v1567_v24, %v5371_v28  ;;  %v1143_v43 = vpop.permute.xlu1 %1142 }
 0x37e   : > { %v1282_v39 = vcombine.low %v1186_v25, %v1193_v26  ;;  %v4015_v40 = vcombine.high %v1186_v25, %v1193_v26  ;;  %v1298_v41 = vcombine.low %v1202_v27, %v1209_v29  ;;  %v4016_v42 = vcombine.high %v1202_v27, %v1209_v29 }
 0x37f   : > { %v1654_v35 = vcombine.low %v1558_v30, %v1565_v31  ;;  %v4021_v36 = vcombine.high %v1558_v30, %v1565_v31  ;;  %v1670_v37 = vcombine.low %v1574_v33, %v1581_v34  ;;  %v4022_v38 = vcombine.high %v1574_v33, %v1581_v34 }
 0x380   : > { %v1214_v50 = vcombine.low %v5348_v9, %v1137_v18  ;;  %v1215_v51 = vcombine.high %v5348_v9, %v1137_v18  ;;  %v1230_v52 = vcombine.low %v5365_v19, %v1143_v43  ;;  %v1231_v53 = vcombine.high %v5365_v19, %v1143_v43 }
 0x381   : > { %v5416_v46 = vrot.slane %v1654_v35, %v5368_v21  ;;  %v5419_v47 = vrot.slane %v4021_v36, %v5368_v21  ;;  %v5422_v48 = vrot.slane %v1670_v37, %v5368_v21  ;;  %v5425_v49 = vrot.slane %v4022_v38, %v5368_v21 }
 0x382   : > { %v5432_v54 = vrot.slane %v1282_v39, %v5368_v21  ;;  %v5435_v55 = vrot.slane %v4015_v40, %v5368_v21  ;;  %v5438_v60 = vrot.slane %v1298_v41, %v5368_v21  ;;  %v5441_v61 = vrot.slane %v4016_v42, %v5368_v21 }
 0x383   : > { %v1222_v62 = vrot.slane %v1214_v50, %v5368_v21  ;;  %v1229_v9 = vrot.slane %v1215_v51, %v5368_v21  ;;  %v1238_v0 = vrot.slane %v1230_v52, %v5368_v21  ;;  %v1245_v19 = vrot.slane %v1231_v53, %v5368_v21 }
 0x384   : > { %v1626_v1 = vrot.slane %v1618_v44, %v5371_v28  ;;  %v1642_v2 = vrot.slane %v1634_v45, %v5371_v28  ;;  %v1686_v3 = vcombine.low %v5416_v46, %v5419_v47  ;;  %v1702_v4 = vcombine.low %v5422_v48, %v5425_v49 }
 0x385   : > { %v1246_v7 = vcombine.low %v1222_v62, %v1238_v0  ;;  %v1247_v8 = vcombine.high %v1222_v62, %v1238_v0  ;;  %v1262_v14 = vcombine.low %v1229_v9, %v1245_v19  ;;  %v1263_v15 = vcombine.high %v1229_v9, %v1245_v19 }
 0x386   : > { %v1314_v16 = vcombine.low %v5432_v54, %v5435_v55  ;;  %v1330_v17 = vcombine.low %v5438_v60, %v5441_v61  ;;  %v1694_v18 = vrot.slane %v1686_v3, %v5371_v28  ;;  %v1710_v20 = vrot.slane %v1702_v4, %v5371_v28 }
 0x387   : > { %v1254_v22 = vrot.slane %v1246_v7, %v5371_v28  ;;  %v1261_v23 = vrot.slane %v1247_v8, %v5371_v28  ;;  %v1270_v24 = vrot.slane %v1262_v14, %v5371_v28  ;;  %v1277_v25 = vrot.slane %v1263_v15, %v5371_v28 }
 0x388   : > { %v1650_v26 = vcombine.low %v1626_v1, %v1642_v2  ;;  %v1718_v27 = vcombine.low %v1694_v18, %v1710_v20  ;;  %v1322_v34 = vrot.slane %v1314_v16, %v5371_v28  ;;  %v1338_v35 = vrot.slane %v1330_v17, %v5371_v28 }
 0x389   : > { %v1350_v29 = vcombine.low %v1254_v22, %v1261_v23  ;;  %v4017_v30 = vcombine.high %v1254_v22, %v1261_v23  ;;  %v1366_v31 = vcombine.low %v1270_v24, %v1277_v25  ;;  %v4018_v33 = vcombine.high %v1270_v24, %v1277_v25 }
 0x38a   : > { %v1722_v36 = vpack.c.bf16 %v1718_v27, %v1650_v26  ;;  %v1346_v44 = vcombine.low %v1322_v34, %v1338_v35  ;;  %v1719_v45 = vcombine.high %v1694_v18, %v1710_v20  ;;  %v1687_v52 = vcombine.high %v5416_v46, %v5419_v47 }
 0x38b   : > { %v1357_v37 = vrot.slane %v1350_v29, %v5368_v21  ;;  %v1365_v38 = vrot.slane %v4017_v30, %v5368_v21  ;;  %v1373_v39 = vrot.slane %v1366_v31, %v5368_v21  ;;  %v1381_v40 = vrot.slane %v4018_v33, %v5368_v21 }
 0x38c   : > { %v2029_v41 = vsel %vm2024_vm1, %v1722_v36, 0  ;;  %v1703_v53 = vcombine.high %v5422_v48, %v5425_v49  ;;  %v1619_v62 = vcombine.high %v5392_v10, %v5395_v11  ;;  %v1635_v9 = vcombine.high %v5398_v12, %v5401_v13 }
 0x38d   : > { %v1382_v42 = vcombine.low %v1357_v37, %v1365_v38  ;;  %v1398_v43 = vcombine.low %v1373_v39, %v1381_v40  ;;  %4231 = vmatpush3.bf16.xpose.msra.mxu1 %v2029_v41  ;;  %v1651_v19 = vcombine.high %v1626_v1, %v1642_v2  ;;  %v1418_v3 = vmul.f32 0.17677669, %v1346_v44 }
 0x38e   : > { %4236 = vmatprep.subr.bf16.mxu1 %v4844_v6  ;;  %v1701_v8 = vrot.slane %v1687_v52, %v5371_v28  ;;  %v1717_v14 = vrot.slane %v1703_v53, %v5371_v28  ;;  %v1633_v46 = vrot.slane %v1619_v62, %v5371_v28  ;;  %v1649_v47 = vrot.slane %v1635_v9, %v5371_v28 }
 0x38f   : > { %v1390_v50 = vrot.slane %v1382_v42, %v5371_v28  ;;  %v1406_v51 = vrot.slane %v1398_v43, %v5371_v28  ;;  %v1723_v7 = vpack.c.bf16 %v1719_v45, %v1651_v19  ;;  %v1383_v48 = vcombine.high %v1357_v37, %v1365_v38  ;;  %v2023_v42 = vld [vmem:[%s5971_s29 + $0x8] sm:$0xff] }
 0x390   : > { %v1399_v49 = vcombine.high %v1373_v39, %v1381_v40  ;;  %v1315_v11 = vcombine.high %v5432_v54, %v5435_v55  ;;  %v1331_v12 = vcombine.high %v5438_v60, %v5441_v61  ;;  %v1347_v1 = vcombine.high %v1322_v34, %v1338_v35  ;;  %v2022_v40 = vld [vmem:[%s5971_s29] sm:$0xff] }
 0x391   : > { %v1414_v0 = vcombine.low %v1390_v50, %v1406_v51  ;;  %v1415_v10 = vcombine.high %v1390_v50, %v1406_v51  ;;  %v2076_v13 = vsel %vm2024_vm1, %v1723_v7, 0  ;;  %v1720_v2 = vcombine.low %v1701_v8, %v1717_v14 }
 0x392   : > { %v1397_v16 = vrot.slane %v1383_v48, %v5371_v28  ;;  %v1413_v17 = vrot.slane %v1399_v49, %v5371_v28  ;;  %v1652_v55 = vcombine.low %v1633_v46, %v1649_v47  ;;  %v1329_v60 = vrot.slane %v1315_v11, %v5371_v28 }
 0x393   : > { %v1419_v4 = vmul.f32 0.17677669, %v1414_v0  ;;  %v1421_v54 = vmul.f32 0.17677669, %v1415_v10  ;;  %v1345_v61 = vrot.slane %v1331_v12, %v5371_v28  ;;  %v1420_v18 = vmul.f32 0.17677669, %v1347_v1 }
 0x394   : > { %v1724_v20 = vpack.c.bf16 %v1720_v2, %v1652_v55  ;;  %v1416_v23 = vcombine.low %v1397_v16, %v1413_v17  ;;  %v1721_v26 = vcombine.high %v1701_v8, %v1717_v14  ;;  %v1653_v29 = vcombine.high %v1633_v46, %v1649_v47 }
 0x395   : > { %v1426_v15 = vpack.c.bf16 %v1419_v4, %v1418_v3  ;;  %v1427_v22 = vpack.c.bf16 %v1421_v54, %v1420_v18  ;;  %v1348_v25 = vcombine.low %v1329_v60, %v1345_v61  ;;  %v1417_v34 = vcombine.high %v1397_v16, %v1413_v17 }
 0x396   : > { %v2123_v24 = vsel %vm2024_vm1, %v1724_v20, 0  ;;  %v1423_v27 = vmul.f32 0.17677669, %v1416_v23  ;;  %v1725_v31 = vpack.c.bf16 %v1721_v26, %v1653_v29  ;;  %v1349_v36 = vcombine.high %v1329_v60, %v1345_v61 }
 0x397   : > { %4233 = vmatmul.mubr.msk.bf16.vlgmr.msra.gmra.mrb[4].mxu1 %vm2024_vm1, %v1426_v15  ;;  %v1422_v30 = vmul.f32 0.17677669, %v1348_v25  ;;  %v1425_v37 = vmul.f32 0.17677669, %v1417_v34  ;;  %v909_v55 = vsub.s32 2, %v5326_v56 }
 0x398   : > { %4237 = vmatpush3.bf16.xpose.msra.mxu1 %v2076_v13  ;;  %4238 = vmatprep.mubr.msk.bf16.mxu1 %vm4846_vm0, %v4844_v6  ;;  %v2170_v35 = vsel %vm2024_vm1, %v1725_v31, 0  ;;  %v1424_v38 = vmul.f32 0.17677669, %v1349_v36 }
 0x399   : > { %4242 = vmatprep.subr.bf16.mxu1 %v4844_v6  ;;  %v1428_v33 = vpack.c.bf16 %v1423_v27, %v1422_v30  ;;  %v910_v60 = vrot.slane %v5330_v58, %v909_v55 }
 0x39a   : > { %v1429_v39 = vpack.c.bf16 %v1425_v37, %v1424_v38 }
 0x39b   : > { %v5534_v61 = vadd.f32 %v5343_v5, %v910_v60  ;;  %v5539_v18 = vadd.f32 %v5339_v63, %v910_v60 }
 0x39f   : > { %4239 = vmatmul.mubr.msk.bf16.vlgmr.msra.gmra.mrb[8].mxu1 %vm2024_vm1, %v1427_v22 }
 0x3a0   : > { %4243 = vmatpush3.bf16.xpose.msra.mxu1 %v2123_v24  ;;  %4244 = vmatprep.mubr.msk.bf16.mxu1 %vm4846_vm0, %v4844_v6 }
 0x3a1   : > { %4248 = vmatprep.subr.bf16.mxu1 %v4844_v6 }
 0x3a7   : > { %4245 = vmatmul.mubr.msk.bf16.vlgmr.msra.gmra.mrb[12].mxu1 %vm2024_vm1, %v1428_v33 }
 0x3a8   : > { %4249 = vmatpush3.bf16.xpose.msra.mxu1 %v2170_v35  ;;  %4250 = vmatprep.mubr.msk.bf16.mxu1 %vm4846_vm0, %v4844_v6 }
 0x3a9   : > { %4260 = vmatprep.subr.bf16.mxu1 %v4844_v6 }
 0x3af   : > { %4251 = vmatmul.mubr.msk.bf16.vlgmr.msra.gmra.mrb[16].mxu1 %vm2024_vm1, %v1429_v39 }
 0x3b0   : > { %4262 = vmatprep.mubr.msk.bf16.mxu1 %vm4846_vm0, %v4844_v6 }
 0x46a   : > { %v2065_v41 = vpop.f32.mrb[4].mxu1 }
 0x46b   : > { %v2066_v43 = vadd.f32 %v2065_v41, %v2022_v40  ;;  %v4234_v44 = vpop.f32.mrb[5].mxu1 }
 0x46c   : > { %v2068_v45 = vpop.f32.mrb[6].mxu1 }
 0x46d   : > { %v2069_v50 = vadd.f32 %v2068_v45, %v2023_v42  ;;  %v4235_v51 = vpop.f32.mrb[7].mxu1  ;;  %v2214_v52 = vsel %vm2213_vm2, %v2066_v43, -inf }
 0x46e   : > { %2215 = vmax.xlane.f32.xlu0 %v2214_v52 }
 0x46f   : > { %v2217_v53 = vsel %vm2213_vm2, %v2069_v50, -inf }
 0x470   : > { %2218 = vmax.xlane.f32.xlu1 %v2217_v53 }
 0x472   : > { %v2112_v62 = vpop.f32.mrb[8].mxu1 }
 0x473   : > { %v2113_v9 = vadd.f32 %v2112_v62, %v2022_v40  ;;  %v4240_v0 = vpop.f32.mrb[9].mxu1 }
 0x474   : > { %v2115_v19 = vpop.f32.mrb[10].mxu1 }
 0x475   : > { %v2116_v3 = vadd.f32 %v2115_v19, %v2023_v42  ;;  %v4241_v4 = vpop.f32.mrb[11].mxu1  ;;  %v2220_v7 = vsel %vm2213_vm2, %v2113_v9, -inf }
 0x476   : > { %2221 = vmax.xlane.f32.xlu0 %v2220_v7 }
 0x477   : > { %v2223_v8 = vsel %vm2213_vm2, %v2116_v3, -inf }
 0x47a   : > { %2224 = vmax.xlane.f32.xlu0 %v2223_v8  ;;  %v2159_v14 = vpop.f32.mrb[12].mxu1 }
 0x47b   : > { %v2160_v46 = vadd.f32 %v2159_v14, %v2022_v40  ;;  %v4246_v47 = vpop.f32.mrb[13].mxu1 }
 0x47c   : > { %v2162_v48 = vpop.f32.mrb[14].mxu1 }
 0x47d   : > { %v5521_v49 = vadd.f32 %v2162_v48, %v2023_v42  ;;  %v4247_v15 = vpop.f32.mrb[15].mxu1  ;;  %v2226_v10 = vsel %vm2213_vm2, %v2160_v46, -inf }
 0x47e   : > { %2227 = vmax.xlane.f32.xlu0 %v2226_v10 }
 0x47f   : > { %v2229_v11 = vsel %vm2213_vm2, %v5521_v49, -inf }
 0x480   : > { %2230 = vmax.xlane.f32.xlu1 %v2229_v11 }
 0x482   : > { %v2206_v12 = vpop.f32.mrb[16].mxu1 }
 0x483   : > { %v2207_v13 = vadd.f32 %v2206_v12, %v2022_v40  ;;  %v4252_v1 = vpop.f32.mrb[17].mxu1 }
 0x484   : > { %v2209_v2 = vpop.f32.mrb[18].mxu1 }
 0x485   : > { %v5526_v16 = vadd.f32 %v2209_v2, %v2023_v42  ;;  %v4253_v17 = vpop.f32.mrb[19].mxu1  ;;  %v2232_v54 = vsel %vm2213_vm2, %v2207_v13, -inf }
 0x486   : > { %2233 = vmax.xlane.f32.xlu0 %v2232_v54 }
 0x487   : > { %v2235_v58 = vsel %vm2213_vm2, %v5526_v16, -inf }
 0x491   : > { %1730 = vrot.lane.b32.xlu1 %v5534_v61, %s4847_s14 }
 0x495   : > { %1734 = vrot.lane.b32.xlu1 %v5539_v18, %s4848_s30 }
 0x49c   : > { %1728 = vrot.lane.b32.xlu0 %v5539_v18, %s4847_s14 }
 0x4a0   : > { %1740 = vrot.lane.b32.xlu0 %v5539_v18, %s4849_s11 }
 0x4b9   : > { %2236 = vmax.xlane.f32.xlu1 %v2235_v58 }
 0x4ca   : > { %1736 = vrot.lane.b32.xlu1 %v5534_v61, %s4848_s30 }
 0x4fb   : > { %v2216_v5 = vpop.xlane.xlu0 %2215 }
 0x4fc   : > { %v2238_v20 = vsub.f32 %v2066_v43, %v2216_v5 }
 0x4fd   : > { %v2219_v63 = vpop.xlane.xlu1 %2218 }
 0x4fe   : > { %v2246_v22 = vmul.f32 1.442695, %v2238_v20  ;;  %v2239_v23 = vsub.f32 %v2069_v50, %v2219_v63 }
 0x500   : > { %4555 = vpow2.f32 %v2246_v22  ;;  %v2248_v24 = vmul.f32 1.442695, %v2239_v23 }
 0x502   : > { %4557 = vpow2.f32 %v2248_v24 }
 0x503   : > { %v2222_v25 = vpop.xlane.xlu0 %2221 }
 0x504   : > { %v2240_v26 = vsub.f32 %v2113_v9, %v2222_v25 }
 0x506   : > { %v2250_v27 = vmul.f32 1.442695, %v2240_v26 }
 0x507   : > { %v2225_v29 = vpop.xlane.xlu0 %2224 }
 0x508   : > { %4559 = vpow2.f32 %v2250_v27  ;;  %v2241_v30 = vsub.f32 %v2116_v3, %v2225_v29 }
 0x50a   : > { %v5551_v31 = vpop.eup %4555  ;;  %v2252_v33 = vmul.f32 1.442695, %v2241_v30 }
 0x50b   : > { %v2228_v34 = vpop.xlane.xlu0 %2227  ;;  %v2262_v35 = vsel %vm2213_vm2, %v5551_v31, 0.0 }
 0x50c   : > { %v5555_v36 = vpop.eup %4557  ;;  %4561 = vpow2.f32 %v2252_v33  ;;  %v2242_v37 = vsub.f32 %v2160_v46, %v2228_v34  ;;  %2263 = vadd.xlane.f32.xlu0 %v2262_v35 }
 0x50d   : > { %v2265_v38 = vsel %vm2213_vm2, %v5555_v36, 0.0  ;;  %v2231_v9 = vpop.xlane.xlu1 %2230 }
 0x50e   : > { %v2254_v39 = vmul.f32 1.442695, %v2242_v37  ;;  %2266 = vadd.xlane.f32.xlu1 %v2265_v38  ;;  %v2243_v0 = vsub.f32 %v5521_v49, %v2231_v9 }
 0x510   : > { %4563 = vpow2.f32 %v2254_v39  ;;  %v2256_v19 = vmul.f32 1.442695, %v2243_v0 }
 0x511   : > { %v1731_v3 = vpop.permute.xlu1 %1730 }
 0x512   : > { %v5559_v40 = vpop.eup %4559 }
 0x513   : > { %v2234_v41 = vpop.xlane.xlu0 %2233  ;;  %v2268_v42 = vsel %vm2213_vm2, %v5559_v40, 0.0 }
 0x514   : > { %v2244_v43 = vsub.f32 %v2207_v13, %v2234_v41  ;;  %2269 = vadd.xlane.f32.xlu0 %v2268_v42 }
 0x515   : > { %v1735_v4 = vpop.permute.xlu1 %1734 }
 0x516   : > { %v5563_v44 = vpop.eup %4561  ;;  %v2258_v45 = vmul.f32 1.442695, %v2244_v43  ;;  %v1746_v12 = vcombine.low %v5539_v18, %v1735_v4  ;;  %v1747_v1 = vcombine.high %v5539_v18, %v1735_v4 }
 0x517   : > { %v2271_v50 = vsel %vm2213_vm2, %v5563_v44, 0.0  ;;  %v1729_v15 = vpop.permute.xlu0 %1728 }
 0x518   : > { %4565 = vpow2.f32 %v2258_v45  ;;  %2272 = vadd.xlane.f32.xlu1 %v2271_v50  ;;  %v1761_v60 = vrot.slane %v1747_v1, %v5368_v21 }
 0x519   : > { %4567 = vpow2.f32 %v2256_v19 }
 0x51a   : > { %v5567_v51 = vpop.eup %4563 }
 0x51b   : > { %v2274_v52 = vsel %vm2213_vm2, %v5567_v51, 0.0  ;;  %v1741_v10 = vpop.permute.xlu0 %1740 }
 0x51c   : > { %2275 = vadd.xlane.f32.xlu0 %v2274_v52  ;;  %v1762_v11 = vcombine.low %v1729_v15, %v1741_v10  ;;  %v1763_v13 = vcombine.high %v1729_v15, %v1741_v10 }
 0x51e   : > { %v1770_v2 = vrot.slane %v1762_v11, %v5368_v21  ;;  %v1777_v17 = vrot.slane %v1763_v13, %v5368_v21 }
 0x520   : > { %v1794_v20 = vcombine.low %v1761_v60, %v1777_v17  ;;  %v1795_v63 = vcombine.high %v1761_v60, %v1777_v17 }
 0x522   : > { %v5571_v53 = vpop.eup %4565  ;;  %v1802_v18 = vrot.slane %v1794_v20, %v5371_v28  ;;  %v1809_v25 = vrot.slane %v1795_v63, %v5371_v28 }
 0x523   : > { %v2280_v62 = vsel %vm2213_vm2, %v5571_v53, 0.0  ;;  %v5579_v14 = vpop.eup %4567 }
 0x524   : > { %2281 = vadd.xlane.f32.xlu0 %v2280_v62  ;;  %v2277_v47 = vsel %vm2213_vm2, %v5579_v14, 0.0  ;;  %v1898_v35 = vcombine.low %v1802_v18, %v1809_v25  ;;  %v4024_v37 = vcombine.high %v1802_v18, %v1809_v25 }
 0x526   : > { %v1905_v9 = vrot.slane %v1898_v35, %v5368_v21  ;;  %v1913_v0 = vrot.slane %v4024_v37, %v5368_v21 }
 0x528   : > { %v1930_v10 = vcombine.low %v1905_v9, %v1913_v0  ;;  %v1931_v63 = vcombine.high %v1905_v9, %v1913_v0 }
 0x529   : > { %1742 = vrot.lane.b32.xlu1 %v5534_v61, %s4849_s11 }
 0x52a   : > { %v1945_v37 = vrot.slane %v1931_v63, %v5371_v28 }
 0x546   : > { %v2237_v7 = vpop.xlane.xlu1 %2236 }
 0x547   : > { %v2245_v8 = vsub.f32 %v5526_v16, %v2237_v7  ;;  %v1754_v16 = vrot.slane %v1746_v12, %v5368_v21 }
 0x549   : > { %v2260_v46 = vmul.f32 1.442695, %v2245_v8  ;;  %v1778_v58 = vcombine.low %v1754_v16, %v1770_v2  ;;  %v1779_v5 = vcombine.high %v1754_v16, %v1770_v2 }
 0x54a   : > { %v1737_v54 = vpop.permute.xlu1 %1736 }
 0x54b   : > { %4569 = vpow2.f32 %v2260_v46  ;;  %v1786_v23 = vrot.slane %v1778_v58, %v5371_v28  ;;  %v1793_v24 = vrot.slane %v1779_v5, %v5371_v28  ;;  %v1814_v29 = vcombine.low %v5534_v61, %v1737_v54 }
 0x54c   : > { %v1815_v30 = vcombine.high %v5534_v61, %v1737_v54  ;;  %v1938_v5 = vrot.slane %v1930_v10, %v5371_v28 }
 0x54d   : > { %2278 = vadd.xlane.f32.xlu1 %v2277_v47  ;;  %v1882_v27 = vcombine.low %v1786_v23, %v1793_v24  ;;  %v4023_v34 = vcombine.high %v1786_v23, %v1793_v24  ;;  %v1822_v43 = vrot.slane %v1814_v29, %v5368_v21 }
 0x54e   : > { %v1829_v45 = vrot.slane %v1815_v30, %v5368_v21 }
 0x54f   : > { %v1889_v42 = vrot.slane %v1882_v27, %v5368_v21  ;;  %v1897_v62 = vrot.slane %v4023_v34, %v5368_v21 }
 0x551   : > { %v1914_v15 = vcombine.low %v1889_v42, %v1897_v62  ;;  %v1915_v20 = vcombine.high %v1889_v42, %v1897_v62 }
 0x553   : > { %v1922_v58 = vrot.slane %v1914_v15, %v5371_v28  ;;  %v1929_v35 = vrot.slane %v1915_v20, %v5371_v28 }
 0x555   : > { %v5583_v48 = vpop.eup %4569 }
 0x556   : > { %v2283_v49 = vsel %vm2213_vm2, %v5583_v48, 0.0 }
 0x557   : > { %2284 = vadd.xlane.f32.xlu0 %v2283_v49 }
 0x599   : > { %v2264_v33 = vpop.xlane.xlu0 %2263 }
 0x59a   : > { %4571 = vrcp.f32 %v2264_v33 }
 0x59b   : > { %v2267_v22 = vpop.xlane.xlu1 %2266 }
 0x59c   : > { %4573 = vrcp.f32 %v2267_v22 }
 0x5a1   : > { %v2270_v50 = vpop.xlane.xlu0 %2269 }
 0x5a4   : > { %v4572_v60 = vpop.eup %4571 }
 0x5a5   : > { %v2273_v26 = vpop.xlane.xlu1 %2272  ;;  %v2294_v9 = vmul.f32 %v4572_v60, %v5551_v31 }
 0x5a6   : > { %4575 = vrcp.f32 %v2273_v26  ;;  %v4574_v22 = vpop.eup %4573 }
 0x5a7   : > { %4577 = vrcp.f32 %v2270_v50 }
 0x5a9   : > { %v1743_v38 = vpop.permute.xlu1 %1742  ;;  %v2276_v31 = vpop.xlane.xlu0 %2275 }
 0x5aa   : > { %v1830_v39 = vcombine.low %v1731_v3, %v1743_v38  ;;  %v1831_v41 = vcombine.high %v1731_v3, %v1743_v38  ;;  %v1946_v38 = vcombine.low %v1922_v58, %v1938_v5  ;;  %4579 = vrcp.f32 %v2276_v31 }
 0x5ac   : > { %v1838_v52 = vrot.slane %v1830_v39, %v5368_v21  ;;  %v1845_v61 = vrot.slane %v1831_v41, %v5368_v21  ;;  %v1947_v41 = vcombine.high %v1922_v58, %v1938_v5 }
 0x5ae   : > { %v1846_v19 = vcombine.low %v1822_v43, %v1838_v52  ;;  %v1847_v3 = vcombine.high %v1822_v43, %v1838_v52  ;;  %v1862_v4 = vcombine.low %v1829_v45, %v1845_v61  ;;  %v1863_v7 = vcombine.high %v1829_v45, %v1845_v61 }
 0x5af   : > { %v2295_v43 = vmul.f32 %v4574_v22, %v5555_v36 }
 0x5b0   : > { %v1854_v8 = vrot.slane %v1846_v19, %v5371_v28  ;;  %v1861_v46 = vrot.slane %v1847_v3, %v5371_v28  ;;  %v1870_v47 = vrot.slane %v1862_v4, %v5371_v28  ;;  %v1877_v49 = vrot.slane %v1863_v7, %v5371_v28  ;;  %v4576_v26 = vpop.eup %4575 }
 0x5b1   : > { %v4578_v34 = vpop.eup %4577  ;;  %v2297_v45 = vmul.f32 %v4576_v26, %v5563_v44  ;;  %v1948_v19 = vcombine.low %v1929_v35, %v1945_v37  ;;  %v1949_v3 = vcombine.high %v1929_v35, %v1945_v37  ;;  %v2302_v4 = vpack.c.bf16 %v2295_v43, %v2294_v9 }
 0x5b2   : > { %v1950_v11 = vcombine.low %v1854_v8, %v1861_v46  ;;  %v4025_v12 = vcombine.high %v1854_v8, %v1861_v46  ;;  %v1966_v13 = vcombine.low %v1870_v47, %v1877_v49  ;;  %v4026_v1 = vcombine.high %v1870_v47, %v1877_v49  ;;  %v2282_v8 = vpop.xlane.xlu0 %2281 }
 0x5b3   : > { %v2296_v0 = vmul.f32 %v4578_v34, %v5559_v40 }
 0x5b4   : > { %v1957_v2 = vrot.slane %v1950_v11, %v5368_v21  ;;  %v1965_v16 = vrot.slane %v4025_v12, %v5368_v21  ;;  %v1973_v17 = vrot.slane %v1966_v13, %v5368_v21  ;;  %v1981_v54 = vrot.slane %v4026_v1, %v5368_v21  ;;  %v4580_v46 = vpop.eup %4579 }
 0x5b5   : > { %v2303_v7 = vpack.c.bf16 %v2297_v45, %v2296_v0  ;;  %v2298_v15 = vmul.f32 %v4580_v46, %v5567_v51  ;;  %v4463_v51 = vld [vmem:[%s5260_s22] sm:$0xff]  }
 0x5b6   : > { %v1982_v23 = vcombine.low %v1957_v2, %v1965_v16  ;;  %v1998_v24 = vcombine.low %v1973_v17, %v1981_v54  ;;  %v1983_v18 = vcombine.high %v1957_v2, %v1965_v16  ;;  %v1999_v25 = vcombine.high %v1973_v17, %v1981_v54  ;;  %v4465_v17 = vld [vmem:[%s5260_s22 + $0x10] sm:$0xff]   ;;  %v4468_v54 = vld [vmem:[%s5260_s22 + $0x28] sm:$0xff]  }
 0x5b8   : > { %v1990_v27 = vrot.slane %v1982_v23, %v5371_v28  ;;  %v2006_v29 = vrot.slane %v1998_v24, %v5371_v28  ;;  %v1997_v30 = vrot.slane %v1983_v18, %v5371_v28  ;;  %v2013_v33 = vrot.slane %v1999_v25, %v5371_v28 }
 0x5ba   : > { %v2014_v39 = vcombine.low %v1990_v27, %v2006_v29  ;;  %v2015_v42 = vcombine.high %v1990_v27, %v2006_v29  ;;  %v2016_v61 = vcombine.low %v1997_v30, %v2013_v33  ;;  %v2017_v62 = vcombine.high %v1997_v30, %v2013_v33 }
 0x5bc   : > { %v2018_v50 = vpack.c.bf16 %v2014_v39, %v1946_v38  ;;  %v2019_v52 = vpack.c.bf16 %v2015_v42, %v1947_v41  ;;  %v2020_v36 = vpack.c.bf16 %v2016_v61, %v1948_v19  ;;  %v2021_v44 = vpack.c.bf16 %v2017_v62, %v1949_v3 }
 0x5be   : > { %4255 = vmatpush3.bf16.msra.mxu0 %v2018_v50  ;;  %4261 = vmatpush3.bf16.msra.mxu1 %v2019_v52 }
 0x5bf   : > { %4266 = vmatprep.subr.bf16.mxu0 %v4844_v6  ;;  %4272 = vmatprep.subr.bf16.mxu1 %v4844_v6 }
 0x5c1   : > { %4257 = vmatmul.mubr.msk.bf16.vlgmr.msra.gmra.mrb[4].mxu0 %vm2213_vm2, %v2302_v4  ;;  %4263 = vmatmul.mubr.msk.bf16.vlgmr.msra.gmra.mrb[20].mxu1 %vm2213_vm2, %v2303_v7 }
 0x5c2   : > { %4267 = vmatpush3.bf16.msra.mxu0 %v2020_v36  ;;  %4273 = vmatpush3.bf16.msra.mxu1 %v2021_v44 }
 0x5c3   : > { %4268 = vmatprep.mubr.msk.bf16.mxu0 %vm4846_vm0, %v4844_v6  ;;  %4274 = vmatprep.mubr.msk.bf16.mxu1 %vm4846_vm0, %v4844_v6 }
 0x5c4   : > { %4278 = vmatprep.subr.bf16.mxu0 %v4844_v6 }
 0x5da   : > { %v2279_v40 = vpop.xlane.xlu1 %2278 }
 0x5db   : > { %4581 = vrcp.f32 %v2279_v40 }
 0x5dc   : > { %4583 = vrcp.f32 %v2282_v8 }
 0x5e4   : > { %v2285_v47 = vpop.xlane.xlu0 %2284 }
 0x5e5   : > { %v4582_v49 = vpop.eup %4581  ;;  %4585 = vrcp.f32 %v2285_v47 }
 0x5e6   : > { %v2299_v10 = vmul.f32 %v4582_v49, %v5579_v14  ;;  %v4584_v12 = vpop.eup %4583  ;;  %v4464_v14 = vld [vmem:[%s5260_s22 + $0x8] sm:$0xff]  }
 0x5e7   : > { %v2300_v1 = vmul.f32 %v4584_v12, %v5571_v53  ;;  %v4466_v53 = vld [vmem:[%s5260_s22 + $0x18] sm:$0xff]  }
 0x5e8   : > { %v2304_v11 = vpack.c.bf16 %v2299_v10, %v2298_v15 }
 0x5ea   : > { %4269 = vmatmul.mubr.msk.bf16.vlgmr.msra.gmra.mrb[8].mxu0 %vm2213_vm2, %v2304_v11 }
 0x5eb   : > { %4294 = vmatprep.mubr.msk.bf16.mxu0 %vm4846_vm0, %v4844_v6  ;;  %4279 = vmatpush3.bf16.msra.mxu0 %v4463_v51 }
 0x5ec   : > { %4280 = vmatprep.subr.bf16.mxu0 %v4844_v6 }
 0x5ef   : > { %v4586_v13 = vpop.eup %4585  ;;  %4281 = vmatpush3.bf16.msra.mxu0 %v4464_v14 }
 0x5f0   : > { %v2301_v2 = vmul.f32 %v4586_v13, %v5583_v48  ;;  %4282 = vmatprep.subr.bf16.mxu0 %v4844_v6  ;;  %v4467_v48 = vld [vmem:[%s5260_s22 + $0x20] sm:$0xff]  }
 0x5f2   : > { %v2305_v16 = vpack.c.bf16 %v2301_v2, %v2300_v1 }
 0x5f3   : > { %4283 = vmatpush3.bf16.msra.mxu0 %v4465_v17 }
 0x5f4   : > { %4275 = vmatmul.mubr.msk.bf16.vlgmr.msra.gmra.mrb[24].mxu1 %vm2213_vm2, %v2305_v16  ;;  %4284 = vmatprep.subr.bf16.mxu0 %v4844_v6 }
 0x5f5   : > { %3188 = vmatprep.mubr.bf16.mxu1 %v4845_v32 }
 0x5f7   : > { %4285 = vmatpush3.bf16.msra.mxu0 %v4466_v53 }
 0x5f8   : > { %4286 = vmatprep.subr.bf16.mxu0 %v4844_v6 }
 0x5fb   : > { %4287 = vmatpush3.bf16.msra.mxu0 %v4467_v48 }
 0x5fc   : > { %4288 = vmatprep.subr.bf16.mxu0 %v4844_v6 }
 0x5ff   : > { %4289 = vmatpush3.bf16.msra.mxu0 %v4468_v54 }
 0x600   : > { %4290 = vmatprep.subr.bf16.mxu0 %v4844_v6 }
 0x694   : > { %v2343_v60 = vpop.f32.mrb[4].mxu0  ;;  %v2387_v58 = vpop.f32.mrb[20].mxu1 }
 0x695   : > { %v4258_v5 = vpop.f32.mrb[5].mxu0  ;;  %v4264_v20 = vpop.f32.mrb[21].mxu1 }
 0x696   : > { %v2346_v63 = vpop.f32.mrb[6].mxu0  ;;  %v2390_v22 = vpop.f32.mrb[22].mxu1 }
 0x697   : > { %v4259_v23 = vpop.f32.mrb[7].mxu0  ;;  %v4265_v24 = vpop.f32.mrb[23].mxu1 }
 0x6bd   : > { %v2431_v18 = vpop.f32.mrb[8].mxu0 }
 0x6be   : > { %v2482_v25 = vcombine.low %v2343_v60, %v2431_v18  ;;  %v2483_v26 = vcombine.high %v2343_v60, %v2431_v18  ;;  %v4270_v27 = vpop.f32.mrb[9].mxu0  ;;  %v4469_v18 = vld [vmem:[%s5260_s22 + $0x30] sm:$0xff]  }
 0x6bf   : > { %v2434_v29 = vpop.f32.mrb[10].mxu0  ;;  %4291 = vmatpush3.bf16.msra.mxu0 %v4469_v18  ;;  %v4479_v18 = vld [vmem:[%s5243_s8 + $0x24] ss:$16 sps:$4 sm:$0xff]  }
 0x6c0   : > { %v2550_v30 = vcombine.low %v2346_v63, %v2434_v29  ;;  %v2551_v33 = vcombine.high %v2346_v63, %v2434_v29  ;;  %v4271_v34 = vpop.f32.mrb[11].mxu0  ;;  %v2490_v41 = vrot.slane %v2482_v25, %v5368_v21  ;;  %v2497_v42 = vrot.slane %v2483_v26, %v5368_v21  ;;  %4292 = vmatprep.subr.bf16.mxu0 %v4844_v6 }
 0x6c2   : > { %v2558_v4 = vrot.slane %v2550_v30, %v5368_v21  ;;  %v2565_v7 = vrot.slane %v2551_v33, %v5368_v21 }
 0x6c7   : > { %v2475_v35 = vpop.f32.mrb[24].mxu1 }
 0x6c8   : > { %v2498_v37 = vcombine.low %v2387_v58, %v2475_v35  ;;  %v2499_v38 = vcombine.high %v2387_v58, %v2475_v35  ;;  %v4276_v39 = vpop.f32.mrb[25].mxu1 }
 0x6c9   : > { %v2478_v43 = vpop.f32.mrb[26].mxu1 }
 0x6ca   : > { %v2506_v45 = vrot.slane %v2498_v37, %v5368_v21  ;;  %v2513_v50 = vrot.slane %v2499_v38, %v5368_v21  ;;  %v2566_v52 = vcombine.low %v2390_v22, %v2478_v43  ;;  %v2567_v61 = vcombine.high %v2390_v22, %v2478_v43  ;;  %v4277_v62 = vpop.f32.mrb[27].mxu1 }
 0x6cc   : > { %v2514_v9 = vcombine.low %v2490_v41, %v2506_v45  ;;  %v2515_v0 = vcombine.high %v2490_v41, %v2506_v45  ;;  %v2530_v19 = vcombine.low %v2497_v42, %v2513_v50  ;;  %v2531_v3 = vcombine.high %v2497_v42, %v2513_v50 }
 0x6cd   : > { %v2574_v36 = vrot.slane %v2566_v52, %v5368_v21  ;;  %v2581_v44 = vrot.slane %v2567_v61, %v5368_v21 }
 0x6ce   : > { %v2522_v31 = vrot.slane %v2514_v9, %v5371_v28  ;;  %v2529_v40 = vrot.slane %v2515_v0, %v5371_v28  ;;  %v2538_v8 = vrot.slane %v2530_v19, %v5371_v28  ;;  %v2545_v46 = vrot.slane %v2531_v3, %v5371_v28  ;;  %v4470_v9 = vld [vmem:[%s5260_s22 + $0x38] sm:$0xff]  }
 0x6cf   : > { %v2582_v47 = vcombine.low %v2558_v4, %v2574_v36  ;;  %v2583_v49 = vcombine.high %v2558_v4, %v2574_v36  ;;  %v2598_v15 = vcombine.low %v2565_v7, %v2581_v44  ;;  %v2599_v10 = vcombine.high %v2565_v7, %v2581_v44  ;;  %4293 = vmatpush3.bf16.msra.mxu0 %v4470_v9  ;;  %v4500_v9 = vld [vmem:[%s5243_s8 + $0x8c] ss:$16 sps:$4 sm:$0xff]  }
 0x6d0   : > { %v2618_v11 = vcombine.low %v2522_v31, %v2529_v40  ;;  %v4035_v12 = vcombine.high %v2522_v31, %v2529_v40  ;;  %v2634_v13 = vcombine.low %v2538_v8, %v2545_v46  ;;  %v4036_v1 = vcombine.high %v2538_v8, %v2545_v46 }
 0x6d1   : > { %v2590_v2 = vrot.slane %v2582_v47, %v5371_v28  ;;  %v2597_v16 = vrot.slane %v2583_v49, %v5371_v28  ;;  %v2606_v51 = vrot.slane %v2598_v15, %v5371_v28  ;;  %v2613_v14 = vrot.slane %v2599_v10, %v5371_v28 }
 0x6d2   : > { %v2625_v17 = vrot.slane %v2618_v11, %v5368_v21  ;;  %v2633_v53 = vrot.slane %v4035_v12, %v5368_v21  ;;  %v2641_v48 = vrot.slane %v2634_v13, %v5368_v21  ;;  %v2649_v54 = vrot.slane %v4036_v1, %v5368_v21 }
 0x6d3   : > { %v2686_v60 = vcombine.low %v2590_v2, %v2597_v16  ;;  %v4037_v58 = vcombine.high %v2590_v2, %v2597_v16  ;;  %v2702_v5 = vcombine.low %v2606_v51, %v2613_v14  ;;  %v4038_v20 = vcombine.high %v2606_v51, %v2613_v14  ;;  %v4039_v51 = vld [vmem:[%s787_s20] ss:$0 sm:$0xff] }
 0x6d4   : > { %v2651_v63 = vcombine.high %v2625_v17, %v2633_v53  ;;  %v2667_v22 = vcombine.high %v2641_v48, %v2649_v54  ;;  %v2650_v23 = vcombine.low %v2625_v17, %v2633_v53  ;;  %v2666_v24 = vcombine.low %v2641_v48, %v2649_v54  ;;  %v4607_v54 = vld [vmem:[#allocation2] sm:$0xff] }
 0x6d5   : > { %v2693_v25 = vrot.slane %v2686_v60, %v5368_v21  ;;  %v2701_v26 = vrot.slane %v4037_v58, %v5368_v21  ;;  %v2709_v27 = vrot.slane %v2702_v5, %v5368_v21  ;;  %v2717_v29 = vrot.slane %v4038_v20, %v5368_v21 }
 0x6d6   : > { %v2665_v30 = vrot.slane %v2651_v63, %v5371_v28  ;;  %v2681_v33 = vrot.slane %v2667_v22, %v5371_v28  ;;  %v2658_v34 = vrot.slane %v2650_v23, %v5371_v28  ;;  %v2674_v35 = vrot.slane %v2666_v24, %v5371_v28  ;;  %v4471_v63 = vld [vmem:[%s5243_s8] ss:$16 sps:$4 sm:$0xff]   ;;  %v4473_v22 = vld [vmem:[%s5243_s8 + $0x4] ss:$16 sps:$4 sm:$0xff]   ;;  %v4474_v23 = vld [vmem:[%s5243_s8 + $0x8] ss:$16 sps:$4 sm:$0xff]  }
 0x6d7   : > { %v2719_v37 = vcombine.high %v2693_v25, %v2701_v26  ;;  %v2735_v38 = vcombine.high %v2709_v27, %v2717_v29  ;;  %v2718_v39 = vcombine.low %v2693_v25, %v2701_v26  ;;  %v2734_v41 = vcombine.low %v2709_v27, %v2717_v29  ;;  %v4476_v24 = vld [vmem:[%s5243_s8 + $0xc] ss:$16 sps:$4 sm:$0xff]   ;;  %3156 = vmatprep.subr.bf16.mxu1 %v4473_v22  ;;  %v4477_v26 = vld [vmem:[%s5243_s8 + $0x20] ss:$16 sps:$4 sm:$0xff]   ;;  %v4480_v27 = vld [vmem:[%s5243_s8 + $0x28] ss:$16 sps:$4 sm:$0xff]  }
 0x6d8   : > { %v2684_v42 = vcombine.low %v2665_v30, %v2681_v33  ;;  %v2682_v43 = vcombine.low %v2658_v34, %v2674_v35  ;;  %v2683_v45 = vcombine.high %v2658_v34, %v2674_v35  ;;  %v2685_v21 = vcombine.high %v2665_v30, %v2681_v33  ;;  %v4482_v25 = vld [vmem:[%s5243_s8 + $0x2c] ss:$16 sps:$4 sm:$0xff]   ;;  %3199 = vmatprep.subr.bf16.mxu0 %v4476_v24  ;;  %v4521_v22 = vld [vmem:[%s5262_s28] sm:$0xff]  }
 0x6d9   : > { %v2733_v50 = vrot.slane %v2719_v37, %v5371_v28  ;;  %v2749_v52 = vrot.slane %v2735_v38, %v5371_v28  ;;  %v2726_v61 = vrot.slane %v2718_v39, %v5371_v28  ;;  %v2742_v62 = vrot.slane %v2734_v41, %v5371_v28  ;;  %3157 = vmatpush1.bf16.msra.mxu1 %v4471_v63  ;;  %v4483_v41 = vld [vmem:[%s5243_s8 + $0x40] ss:$16 sps:$4 sm:$0xff]   ;;  %v4520_v63 = vld [vmem:[%s5262_s28 + $0xc0] sm:$0xff]  }
 0x6da   : > { %3158 = vmatprep.subr.bf16.mxu1 %v4479_v18  ;;  %v4523_v24 = vld [vmem:[%s5262_s28 + $0x48] sm:$0xff]  }
 0x6db   : > { %v2752_v0 = vcombine.low %v2733_v50, %v2749_v52  ;;  %v2751_v19 = vcombine.high %v2726_v61, %v2742_v62  ;;  %v2750_v3 = vcombine.low %v2726_v61, %v2742_v62  ;;  %v2753_v4 = vcombine.high %v2733_v50, %v2749_v52  ;;  %v4491_v50 = vld [vmem:[%s5243_s8 + $0x64] ss:$16 sps:$4 sm:$0xff]   ;;  %v4492_v52 = vld [vmem:[%s5243_s8 + $0x68] ss:$16 sps:$4 sm:$0xff]   ;;  %v4494_v61 = vld [vmem:[%s5243_s8 + $0x6c] ss:$16 sps:$4 sm:$0xff]  }
 0x6dc   : > { %v4497_v62 = vld [vmem:[%s5243_s8 + $0x84] ss:$16 sps:$4 sm:$0xff]   ;;  %v4524_v18 = vld [vmem:[%s5262_s28 + $0xc8] sm:$0xff]  }
 0x6dd   : > { %v4421_v7 = vpack.i.bf16 %v2752_v0, %v2684_v42  ;;  %v4416_v6 = vpack.i.bf16 %v2751_v19, %v2683_v45  ;;  %v4426_v36 = vpack.i.bf16 %v2753_v4, %v2685_v21  ;;  %3159 = vmatpush1.bf16.msra.mxu1 %v4477_v26  ;;  %v4485_v42 = vld [vmem:[%s5243_s8 + $0x44] ss:$16 sps:$4 sm:$0xff]   ;;  %v4488_v45 = vld [vmem:[%s5243_s8 + $0x4c] ss:$16 sps:$4 sm:$0xff]   ;;  %v4489_v21 = vld [vmem:[%s5243_s8 + $0x60] ss:$16 sps:$4 sm:$0xff]  }
 0x6de   : > { %3160 = vmatprep.subr.bf16.mxu1 %v4485_v42  ;;  %v4495_v0 = vld [vmem:[%s5243_s8 + $0x80] ss:$16 sps:$4 sm:$0xff]   ;;  %v4498_v19 = vld [vmem:[%s5243_s8 + $0x88] ss:$16 sps:$4 sm:$0xff]   ;;  %v4506_v4 = vld [vmem:[%s5243_s8 + $0xac] ss:$16 sps:$4 sm:$0xff]  }
 0x6df   : > { %4422 = vrot.lane.b32.xlu1 %v4421_v7, %s4848_s30  ;;  %4417 = vrot.lane.b32.xlu0 %v4416_v6, %s4849_s11  ;;  %v4501_v7 = vld [vmem:[%s5243_s8 + $0xa0] ss:$16 sps:$4 sm:$0xff]   ;;  %v4504_v6 = vld [vmem:[%s5243_s8 + $0xa8] ss:$16 sps:$4 sm:$0xff]  }
 0x6e0   : > { %v4526_v26 = vld [vmem:[%s5262_s28 + $0x88] sm:$0xff]   ;;  %v4537_v42 = vld [vmem:[%s5262_s28 + $0x20] sm:$0xff]  }
 0x6e1   : > { %3161 = vmatpush1.bf16.msra.mxu1 %v4483_v41  ;;  %v4536_v41 = vld [vmem:[%s5262_s28 + $0xe0] sm:$0xff]  }
 0x6e2   : > { %3162 = vmatprep.subr.bf16.mxu1 %v4491_v50  ;;  %v4541_v50 = vld [vmem:[%s5262_s28 + $0x28] sm:$0xff]  }
 0x6e3   : > { %4427 = vrot.lane.b32.xlu1 %v4426_v36, %s4847_s14  ;;  %v4509_v36 = vld [vmem:[%s5243_s8 + $0xc4] ss:$16 sps:$4 sm:$0xff]  }
 0x6e5   : > { %3163 = vmatpush1.bf16.msra.mxu1 %v4489_v21  ;;  %v4540_v21 = vld [vmem:[%s5262_s28 + $0xe8] sm:$0xff]  }
 0x6e6   : > { %3164 = vmatprep.subr.bf16.mxu1 %v4497_v62  ;;  %v4544_v62 = vld [vmem:[%s5262_s28 + $0xf0] sm:$0xff]  }
 0x6e9   : > { %3165 = vmatpush1.bf16.msra.mxu1 %v4495_v0  ;;  %v4546_v0 = vld [vmem:[%s5262_s28 + $0xb0] sm:$0xff]  }
 0x751   : > { %v4423_v44 = vpop.permute.xlu1 %4422  ;;  %v4418_v31 = vpop.permute.xlu0 %4417 }
 0x752   : > { %v4420_v40 = vunpack.i.h.bf16 %v4418_v31  ;;  %v4419_v8 = vunpack.i.l.bf16 %v4418_v31  ;;  %v4425_v28 = vunpack.i.h.bf16 %v4423_v44  ;;  %v4424_v46 = vunpack.i.l.bf16 %v4423_v44  ;;  %v4512_v44 = vld [vmem:[%s5243_s8 + $0xcc] ss:$16 sps:$4 sm:$0xff]   ;;  %v4507_v31 = vld [vmem:[%s5243_s8 + $0xc0] ss:$16 sps:$4 sm:$0xff]  }
 0x754   : > { %v2778_v47 = vsel %vm2024_vm1, %v2682_v43, %v4419_v8  ;;  %v2779_v49 = vsel %vm2024_vm1, %v2750_v3, %v4420_v40  ;;  %v4486_v43 = vld [vmem:[%s5243_s8 + $0x48] ss:$16 sps:$4 sm:$0xff]   ;;  %v4503_v3 = vld [vmem:[%s5243_s8 + $0xa4] ss:$16 sps:$4 sm:$0xff]  }
 0x755   : > { %v4428_v15 = vpop.permute.xlu1 %4427  ;;  %v2781_v12 = vsel %vm2780_vm3, %v2778_v47, %v4424_v46  ;;  %v2782_v13 = vsel %vm2780_vm3, %v2779_v49, %v4425_v28  ;;  %3166 = vmatprep.subr.bf16.mxu1 %v4503_v3  ;;  %v4510_v40 = vld [vmem:[%s5243_s8 + $0xc8] ss:$16 sps:$4 sm:$0xff]   ;;  %v4515_v8 = vld [vmem:[%s5243_s8 + $0xe4] ss:$16 sps:$4 sm:$0xff]   ;;  %v4518_v28 = vld [vmem:[%s5243_s8 + $0xec] ss:$16 sps:$4 sm:$0xff]  }
 0x756   : > { %v4430_v10 = vunpack.i.h.bf16 %v4428_v15  ;;  %v4429_v11 = vunpack.i.l.bf16 %v4428_v15  ;;  %3167 = vmatpush1.bf16.msra.mxu1 %v4501_v7  ;;  %v4513_v46 = vld [vmem:[%s5243_s8 + $0xe0] ss:$16 sps:$4 sm:$0xff]   ;;  %v4516_v47 = vld [vmem:[%s5243_s8 + $0xe8] ss:$16 sps:$4 sm:$0xff]  }
 0x757   : > { %3168 = vmatprep.subr.bf16.mxu1 %v4509_v36  ;;  %v4548_v3 = vld [vmem:[%s5262_s28 + $0xf8] sm:$0xff]   ;;  %v2990_v36 = vsub.s32 3, %v5326_v56 }
 0x758   : > { %v2784_v1 = vsel %vm2783_vm4, %v2781_v12, %v4429_v11  ;;  %v2785_v2 = vsel %vm2783_vm4, %v2782_v13, %v4430_v10  ;;  %v4550_v7 = vld [vmem:[%s5262_s28 + $0xb8] sm:$0xff]  }
 0x759   : > { %v2786_v16 = vpack.c.bf16 %v2785_v2, %v2784_v1 }
 0x75a   : > { %3169 = vmatpush1.bf16.msra.mxu1 %v4507_v31 }
 0x75b   : > { %4295 = vmatmul.mubr.bf16.vlgmr.msra.gmra.mrb[12].mxu0 %v2786_v16  ;;  %3170 = vmatprep.subr.bf16.mxu1 %v4515_v8  ;;  %v4048_v16 = vld [vmem:[%s5974_s16] ss:$0 sm:$0xff] }
 0x75c   : > { %3231 = vmatprep.mubr.bf16.mxu0 %v4845_v32  ;;  %v4608_v32 = vld [vmem:[#allocation2 + $0x8] sm:$0xff]  ;;  %3200 = vmatpush1.bf16.msra.mxu0 %v4474_v23  ;;  %v4522_v23 = vld [vmem:[%s5262_s28 + $0x80] sm:$0xff]  }
 0x75d   : > { %3201 = vmatprep.subr.bf16.mxu0 %v4482_v25  ;;  %v4525_v25 = vld [vmem:[%s5262_s28 + $0x8] sm:$0xff]  }
 0x75e   : > { %3171 = vmatpush1.bf16.msra.mxu1 %v4513_v46 }
 0x760   : > { %3202 = vmatpush1.bf16.msra.mxu0 %v4480_v27  ;;  %v4527_v27 = vld [vmem:[%s5262_s28 + $0x50] sm:$0xff]  }
 0x761   : > { %3203 = vmatprep.subr.bf16.mxu0 %v4488_v45  ;;  %v4539_v45 = vld [vmem:[%s5262_s28 + $0x68] sm:$0xff]  }
 0x764   : > { %3204 = vmatpush1.bf16.msra.mxu0 %v4486_v43  ;;  %v4538_v43 = vld [vmem:[%s5262_s28 + $0xa0] sm:$0xff]  }
 0x765   : > { %3205 = vmatprep.subr.bf16.mxu0 %v4494_v61  ;;  %v4543_v61 = vld [vmem:[%s5262_s28 + $0x70] sm:$0xff]  }
 0x768   : > { %3206 = vmatpush1.bf16.msra.mxu0 %v4492_v52  ;;  %v4542_v52 = vld [vmem:[%s5262_s28 + $0xa8] sm:$0xff]  }
 0x769   : > { %3207 = vmatprep.subr.bf16.mxu0 %v4500_v9  ;;  %v4545_v9 = vld [vmem:[%s5262_s28 + $0x30] sm:$0xff]  }
 0x76c   : > { %3208 = vmatpush1.bf16.msra.mxu0 %v4498_v19  ;;  %v4547_v19 = vld [vmem:[%s5262_s28 + $0x78] sm:$0xff]  }
 0x76d   : > { %3209 = vmatprep.subr.bf16.mxu0 %v4506_v4  ;;  %v4549_v4 = vld [vmem:[%s5262_s28 + $0x38] sm:$0xff]  }
 0x770   : > { %3210 = vmatpush1.bf16.msra.mxu0 %v4504_v6  ;;  %v2974_v6 = vld [vmem:[%s5249_s3] sm:$0xf] }
 0x771   : > { %3211 = vmatprep.subr.bf16.mxu0 %v4512_v44  ;;  %v2979_v44 = vrot.slane %v2974_v6, %v901_v57  ;;  %v2987_v31 = vrot.slane %v2974_v6, %v909_v55  ;;  %v2991_v8 = vrot.slane %v2974_v6, %v2990_v36 }
 0x774   : > { %3212 = vmatpush1.bf16.msra.mxu0 %v4510_v40  ;;  %v2983_v40 = vrot.slane %v2974_v6, %v905_v59 }
 0x775   : > { %3213 = vmatprep.subr.bf16.mxu0 %v4518_v28 }
 0x778   : > { %3214 = vmatpush1.bf16.msra.mxu0 %v4516_v47 }
 0x779   : > { %4188 = vmatprep.subr.bf16.mxu0 %v4520_v63 }
 0x82e   : > { %v2892_v14 = vpop.f32.mrb[12].mxu0 }
 0x82f   : > { %v2893_v17 = vadd.f32 %v4039_v51, %v2892_v14  ;;  %v4296_v53 = vpop.f32.mrb[13].mxu0 }
 0x830   : > { %v2895_v48 = vpop.f32.mrb[14].mxu0  ;;  %v4049_v53 = vld [vmem:[%s5976_s0] ss:$0 sm:$0xff] }
 0x831   : > { %v5703_v60 = vadd.f32 %v4607_v54, %v2893_v17  ;;  %v2896_v58 = vadd.f32 %v4039_v51, %v2895_v48  ;;  %v4297_v5 = vpop.f32.mrb[15].mxu0 }
 0x833   : > { %v5705_v20 = vadd.f32 %v4608_v32, %v2896_v58  ;;  %2903 = vadd.xlane.f32.xlu1 %v5703_v60  ;;  %v4519_v32 = vld [vmem:[%s5262_s28 + $0x40] sm:$0xff]  }
 0x834   : > { %4166 = vmatprep.subr.bf16.mxu1 %v4519_v32 }
 0x835   : > { %2905 = vadd.xlane.f32.xlu0 %v5705_v20 }
 0x8c0   : > { %v2904_v29 = vpop.xlane.xlu1 %2903 }
 0x8c1   : > { %v2907_v30 = vmul.f32 0.0078125, %v2904_v29  ;;  %v4528_v29 = vld [vmem:[%s5262_s28 + $0xd0] sm:$0xff]  }
 0x8c2   : > { %v2906_v33 = vpop.xlane.xlu0 %2905 }
 0x8c3   : > { %v5718_v34 = vsub.f32 %v5703_v60, %v2907_v30  ;;  %v2908_v35 = vmul.f32 0.0078125, %v2906_v33  ;;  %v4529_v30 = vld [vmem:[%s5262_s28 + $0x10] sm:$0xff]  }
 0x8c4   : > { %v4530_v33 = vld [vmem:[%s5262_s28 + $0x90] sm:$0xff]  }
 0x8c5   : > { %v5721_v37 = vsub.f32 %v5705_v20, %v2908_v35  ;;  %v2911_v38 = vmul.f32 %v5718_v34, %v5718_v34  ;;  %v4532_v35 = vld [vmem:[%s5262_s28 + $0xd8] sm:$0xff]  }
 0x8c7   : > { %2913 = vadd.xlane.f32.xlu0 %v2911_v38  ;;  %v2912_v39 = vmul.f32 %v5721_v37, %v5721_v37  ;;  %v4534_v38 = vld [vmem:[%s5262_s28 + $0x98] sm:$0xff]  }
 0x8cb   : > { %2915 = vadd.xlane.f32.xlu0 %v2912_v39  ;;  %v4535_v39 = vld [vmem:[%s5262_s28 + $0x60] sm:$0xff]  }
 0x954   : > { %v2914_v49 = vpop.xlane.xlu0 %2913 }
 0x955   : > { %v2917_v15 = vmul.f32 0.0078125, %v2914_v49 }
 0x957   : > { %v2919_v10 = vadd.f32 1e-05, %v2917_v15 }
 0x958   : > { %v2916_v11 = vpop.xlane.xlu0 %2915 }
 0x959   : > { %4587 = vrsqrt.f32 %v2919_v10  ;;  %v2918_v12 = vmul.f32 0.0078125, %v2916_v11 }
 0x95b   : > { %v2920_v13 = vadd.f32 1e-05, %v2918_v12 }
 0x95d   : > { %4589 = vrsqrt.f32 %v2920_v13 }
 0x963   : > { %v4588_v1 = vpop.eup %4587 }
 0x964   : > { %v2923_v2 = vmul.f32 %v4588_v1, %v5718_v34  ;;  %v4531_v34 = vld [vmem:[%s5262_s28 + $0x58] sm:$0xff]  }
 0x966   : > { %v2931_v17 = vmul.f32 %v4048_v16, %v2923_v2 }
 0x967   : > { %v4590_v51 = vpop.eup %4589 }
 0x968   : > { %v2924_v14 = vmul.f32 %v4590_v51, %v5721_v37  ;;  %v2939_v54 = vadd.f32 %v4049_v53, %v2931_v17  ;;  %v4533_v37 = vld [vmem:[%s5262_s28 + $0x18] sm:$0xff]  }
 0x96a   : > { %v2932_v48 = vmul.f32 %v4048_v16, %v2924_v14 }
 0x96c   : > { %v2940_v58 = vadd.f32 %v4049_v53, %v2932_v48 }
 0x96e   : > { %v2941_v5 = vpack.c.bf16 %v2940_v58, %v2939_v54 }
 0x970   : > { %3189 = vmatmul.mubr.bf16.vlgmr.msra.gmra.mrb[28].mxu1 %v2941_v5  ;;  %3232 = vmatmul.mubr.bf16.vlgmr.msra.gmra.mrb[16].mxu0 %v2941_v5 }
 0x971   : > { %4167 = vmatpush3.bf16.msra.mxu1 %v4521_v22  ;;  %4189 = vmatpush3.bf16.msra.mxu0 %v4522_v23 }
 0x972   : > { %4168 = vmatprep.subr.bf16.mxu1 %v4523_v24  ;;  %4190 = vmatprep.subr.bf16.mxu0 %v4524_v18 }
 0x975   : > { %4169 = vmatpush3.bf16.msra.mxu1 %v4525_v25  ;;  %4191 = vmatpush3.bf16.msra.mxu0 %v4526_v26 }
 0x976   : > { %4170 = vmatprep.subr.bf16.mxu1 %v4527_v27  ;;  %4192 = vmatprep.subr.bf16.mxu0 %v4528_v29 }
 0x979   : > { %4171 = vmatpush3.bf16.msra.mxu1 %v4529_v30  ;;  %4193 = vmatpush3.bf16.msra.mxu0 %v4530_v33 }
 0x97a   : > { %4172 = vmatprep.subr.bf16.mxu1 %v4531_v34  ;;  %4194 = vmatprep.subr.bf16.mxu0 %v4532_v35 }
 0x97d   : > { %4173 = vmatpush3.bf16.msra.mxu1 %v4533_v37  ;;  %4195 = vmatpush3.bf16.msra.mxu0 %v4534_v38 }
 0x97e   : > { %4174 = vmatprep.subr.bf16.mxu1 %v4535_v39  ;;  %4196 = vmatprep.subr.bf16.mxu0 %v4536_v41 }
 0x981   : > { %4175 = vmatpush3.bf16.msra.mxu1 %v4537_v42  ;;  %4197 = vmatpush3.bf16.msra.mxu0 %v4538_v43 }
 0x982   : > { %4176 = vmatprep.subr.bf16.mxu1 %v4539_v45  ;;  %4198 = vmatprep.subr.bf16.mxu0 %v4540_v21 }
 0x985   : > { %4177 = vmatpush3.bf16.msra.mxu1 %v4541_v50  ;;  %4199 = vmatpush3.bf16.msra.mxu0 %v4542_v52 }
 0x986   : > { %4178 = vmatprep.subr.bf16.mxu1 %v4543_v61  ;;  %4200 = vmatprep.subr.bf16.mxu0 %v4544_v62 }
 0x989   : > { %4179 = vmatpush3.bf16.msra.mxu1 %v4545_v9  ;;  %4201 = vmatpush3.bf16.msra.mxu0 %v4546_v0 }
 0x98a   : > { %4180 = vmatprep.subr.bf16.mxu1 %v4547_v19  ;;  %4202 = vmatprep.subr.bf16.mxu0 %v4548_v3 }
 0x98d   : > { %4181 = vmatpush3.bf16.msra.mxu1 %v4549_v4  ;;  %4203 = vmatpush3.bf16.msra.mxu0 %v4550_v7 }
 0xa43   : > { %v3190_v28 = vpop.f32.mrb[28].mxu1  ;;  %v3233_v46 = vpop.f32.mrb[16].mxu0 }
 0xa44   : > { %v5803_v47 = vadd.f32 %v3190_v28, %v2979_v44  ;;  %v5805_v49 = vadd.f32 %v3233_v46, %v2987_v31  ;;  %v3192_v15 = vpop.f32.mrb[29].mxu1  ;;  %v3235_v10 = vpop.f32.mrb[17].mxu0 }
 0xa45   : > { %v5807_v11 = vadd.f32 %v3192_v15, %v2983_v40  ;;  %v5809_v12 = vadd.f32 %v3235_v10, %v2991_v8  ;;  %v3194_v57 = vpop.f32.mrb[30].mxu1  ;;  %v3237_v13 = vpop.f32.mrb[18].mxu0 }
 0xa46   : > { %v3250_v55 = vmul.f32 0.044715, %v5803_v47  ;;  %v3252_v56 = vmul.f32 0.044715, %v5805_v49  ;;  %v3195_v59 = vadd.f32 %v3194_v57, %v2979_v44  ;;  %v3238_v1 = vadd.f32 %v3237_v13, %v2987_v31  ;;  %v3196_v2 = vpop.f32.mrb[31].mxu1  ;;  %v3239_v16 = vpop.f32.mrb[19].mxu0 }
 0xa47   : > { %v3251_v51 = vmul.f32 0.044715, %v5807_v11  ;;  %v3253_v14 = vmul.f32 0.044715, %v5809_v12  ;;  %v5815_v17 = vadd.f32 %v3196_v2, %v2983_v40  ;;  %v5817_v53 = vadd.f32 %v3239_v16, %v2991_v8 }
 0xa48   : > { %v3258_v48 = vmul.f32 %v3250_v55, %v5803_v47  ;;  %v3260_v54 = vmul.f32 %v3252_v56, %v5805_v49  ;;  %v3254_v58 = vmul.f32 0.044715, %v3195_v59  ;;  %v3256_v5 = vmul.f32 0.044715, %v3238_v1 }
 0xa49   : > { %v3259_v32 = vmul.f32 %v3251_v51, %v5807_v11  ;;  %v3261_v63 = vmul.f32 %v3253_v14, %v5809_v12  ;;  %v3255_v22 = vmul.f32 0.044715, %v5815_v17  ;;  %v3257_v23 = vmul.f32 0.044715, %v5817_v53 }
 0xa4a   : > { %v3266_v24 = vmul.f32 %v3258_v48, %v5803_v47  ;;  %v3268_v18 = vmul.f32 %v3260_v54, %v5805_v49  ;;  %v3262_v25 = vmul.f32 %v3254_v58, %v3195_v59  ;;  %v3264_v26 = vmul.f32 %v3256_v5, %v3238_v1 }
 0xa4b   : > { %v3267_v27 = vmul.f32 %v3259_v32, %v5807_v11  ;;  %v3269_v29 = vmul.f32 %v3261_v63, %v5809_v12  ;;  %v3263_v30 = vmul.f32 %v3255_v22, %v5815_v17  ;;  %v3265_v33 = vmul.f32 %v3257_v23, %v5817_v53 }
 0xa4c   : > { %v3274_v34 = vadd.f32 %v3266_v24, %v5803_v47  ;;  %v3276_v35 = vadd.f32 %v3268_v18, %v5805_v49  ;;  %v3270_v37 = vmul.f32 %v3262_v25, %v3195_v59  ;;  %v3272_v38 = vmul.f32 %v3264_v26, %v3238_v1 }
 0xa4d   : > { %v3271_v39 = vmul.f32 %v3263_v30, %v5815_v17  ;;  %v3273_v41 = vmul.f32 %v3265_v33, %v5817_v53  ;;  %v3275_v50 = vadd.f32 %v3267_v27, %v5807_v11  ;;  %v3277_v9 = vadd.f32 %v3269_v29, %v5809_v12 }
 0xa4e   : > { %v3282_v42 = vmul.f32 0.7978846, %v3274_v34  ;;  %v3284_v43 = vmul.f32 0.7978846, %v3276_v35  ;;  %v3278_v45 = vadd.f32 %v3270_v37, %v3195_v59  ;;  %v3280_v21 = vadd.f32 %v3272_v38, %v3238_v1 }
 0xa4f   : > { %v3279_v52 = vadd.f32 %v3271_v39, %v5815_v17  ;;  %v3283_v0 = vmul.f32 0.7978846, %v3275_v50  ;;  %v3281_v3 = vadd.f32 %v3273_v41, %v5817_v53  ;;  %v3285_v4 = vmul.f32 0.7978846, %v3277_v9 }
 0xa50   : > { %4591 = vtanh.f32 %v3282_v42  ;;  %v3286_v61 = vmul.f32 0.7978846, %v3278_v45  ;;  %v3288_v62 = vmul.f32 0.7978846, %v3280_v21  ;;  %v3242_v28 = vmul.f32 0.5, %v5803_v47 }
 0xa51   : > { %4593 = vtanh.f32 %v3284_v43  ;;  %v3287_v19 = vmul.f32 0.7978846, %v3279_v52  ;;  %v3289_v7 = vmul.f32 0.7978846, %v3281_v3  ;;  %v3246_v46 = vmul.f32 0.5, %v3195_v59 }
 0xa52   : > { %4595 = vtanh.f32 %v3286_v61  ;;  %v3244_v57 = vmul.f32 0.5, %v5805_v49  ;;  %v3248_v13 = vmul.f32 0.5, %v3238_v1  ;;  %v3243_v2 = vmul.f32 0.5, %v5807_v11 }
 0xa53   : > { %4597 = vtanh.f32 %v3288_v62  ;;  %v3247_v54 = vmul.f32 0.5, %v5815_v17  ;;  %v3245_v59 = vmul.f32 0.5, %v5809_v12  ;;  %v3249_v63 = vmul.f32 0.5, %v5817_v53  ;;  %v4082_v12 = vld [vmem:[%s805_s21] ss:$0 sm:$0xff] }
 0xa54   : > { %4599 = vtanh.f32 %v3283_v0 }
 0xa55   : > { %4601 = vtanh.f32 %v3287_v19 }
 0xa56   : > { %4603 = vtanh.f32 %v3285_v4 }
 0xa57   : > { %4605 = vtanh.f32 %v3289_v7 }
 0xa5a   : > { %v4592_v6 = vpop.eup %4591 }
 0xa5b   : > { %v4594_v36 = vpop.eup %4593  ;;  %v3298_v44 = vadd.f32 1.0, %v4592_v6 }
 0xa5c   : > { %v4596_v31 = vpop.eup %4595  ;;  %v3300_v40 = vadd.f32 1.0, %v4594_v36 }
 0xa5d   : > { %v4598_v8 = vpop.eup %4597  ;;  %v3302_v15 = vadd.f32 1.0, %v4596_v31  ;;  %v3306_v51 = vmul.f32 %v3298_v44, %v3242_v28 }
 0xa5e   : > { %v4600_v10 = vpop.eup %4599  ;;  %v3304_v55 = vadd.f32 1.0, %v4598_v8  ;;  %v3308_v5 = vmul.f32 %v3300_v40, %v3244_v57 }
 0xa5f   : > { %v4602_v56 = vpop.eup %4601  ;;  %v3299_v16 = vadd.f32 1.0, %v4600_v10  ;;  %v3310_v14 = vmul.f32 %v3302_v15, %v3246_v46  ;;  %v4116_v10 = vld [vmem:[#allocation3] ss:$0 sm:$0xff] (!%p4115_p0) }
 0xa60   : > { %v4604_v48 = vpop.eup %4603  ;;  %v3303_v58 = vadd.f32 1.0, %v4602_v56  ;;  %v3312_v32 = vmul.f32 %v3304_v55, %v3248_v13  ;;  %v4117_v56 = vld [vmem:[#allocation5] ss:$0 sm:$0xff] (!%p4115_p0) }
 0xa61   : > { %v4606_v47 = vpop.eup %4605  ;;  %v3301_v49 = vadd.f32 1.0, %v4604_v48  ;;  %v3314_v1 = vpack.c.bf16 %v3310_v14, %v3306_v51  ;;  %v3307_v22 = vmul.f32 %v3299_v16, %v3243_v2 }
 0xa62   : > { %v3311_v23 = vmul.f32 %v3303_v58, %v3247_v54  ;;  %v3305_v11 = vadd.f32 1.0, %v4606_v47  ;;  %v3316_v24 = vpack.c.bf16 %v3312_v32, %v3308_v5 }
 0xa63   : > { %v3309_v25 = vmul.f32 %v3301_v49, %v3245_v59 }
 0xa64   : > { %v3315_v18 = vpack.c.bf16 %v3311_v23, %v3307_v22  ;;  %v3313_v26 = vmul.f32 %v3305_v11, %v3249_v63 }
 0xa66   : > { %3613 = vmatprep.mubr.bf16.mxu1 %v3315_v18  ;;  %v3317_v17 = vpack.c.bf16 %v3313_v26, %v3309_v25 }
 0xa67   : > { %3614 = vmatmul.mubr.bf16.vlgmr.msra.gmra.mrb[32].mxu1 %v3314_v1 }
 0xa68   : > { %3654 = vmatprep.mubr.bf16.mxu0 %v3317_v17 }
 0xa69   : > { %3655 = vmatmul.mubr.bf16.vlgmr.msra.gmra.mrb[20].mxu0 %v3316_v24 }
 0xb3a   : > { %v4182_v27 = vpop.f32.mrb[32].mxu1 }
 0xb3b   : > { %v4183_v53 = vpop.f32.mrb[33].mxu1 }
 0xb3c   : > { %v4204_v29 = vpop.f32.mrb[20].mxu0  ;;  %v4184_v30 = vadd.f32 %v4183_v53, %v4182_v27  ;;  %v4185_v33 = vpop.f32.mrb[34].mxu1 }
 0xb3d   : > { %v4205_v34 = vpop.f32.mrb[21].mxu0  ;;  %v4186_v35 = vpop.f32.mrb[35].mxu1 }
 0xb3e   : > { %v3616_v37 = vadd.f32 %v4184_v30, %v4082_v12  ;;  %v4206_v38 = vadd.f32 %v4205_v34, %v4204_v29  ;;  %v4207_v39 = vpop.f32.mrb[22].mxu0  ;;  %v4187_v41 = vadd.f32 %v4186_v35, %v4185_v33 }
 0xb3f   : > { %v4208_v42 = vpop.f32.mrb[23].mxu0 }
 0xb40   : > { %v3657_v43 = vadd.f32 %v4206_v38, %v3616_v37  ;;  %v3619_v45 = vadd.f32 %v4187_v41, %v4082_v12  ;;  %v4209_v21 = vadd.f32 %v4208_v42, %v4207_v39  ;;  %3670 = sbr.rel (%p4115_p0) target bundleno = 3210 (0xc8a), region = 112 }
 0xb42   : > { %v3663_v50 = vadd.f32 %v3657_v43, %v5703_v60  ;;  %v3660_v52 = vadd.f32 %v4209_v21, %v3619_v45 }
 0xb44   : > { %3665 = vst [vmem:[#allocation2] sm:$0xff] %v3663_v50  ;;  %v3664_v61 = vadd.f32 %v3660_v52, %v5705_v20 }
 0xb46   : > { %3666 = vst [vmem:[#allocation2 + $0x8] sm:$0xff] %v3664_v61 }
 0xb4b   : > { %v3671_v62 = vld [vmem:[#allocation2] sm:$0xff] }
 0xb4c   : > { %3675 = vadd.xlane.f32.xlu0 %v3671_v62 }
 0xb4d   : > { %v3672_v9 = vld [vmem:[#allocation2 + $0x8] sm:$0xff] }
 0xb50   : > { %3677 = vadd.xlane.f32.xlu0 %v3672_v9 }
 0xbd9   : > { %v3676_v0 = vpop.xlane.xlu0 %3675 }
 0xbda   : > { %v3679_v19 = vmul.f32 0.0078125, %v3676_v0 }
 0xbdc   : > { %v3681_v3 = vsub.f32 %v3671_v62, %v3679_v19 }
 0xbdd   : > { %v3678_v4 = vpop.xlane.xlu0 %3677 }
 0xbde   : > { %v3680_v7 = vmul.f32 0.0078125, %v3678_v4  ;;  %v3683_v6 = vmul.f32 %v3681_v3, %v3681_v3 }
 0xbe0   : > { %v3682_v36 = vsub.f32 %v3672_v9, %v3680_v7  ;;  %3685 = vadd.xlane.f32.xlu1 %v3683_v6 }
 0xbe2   : > { %v3684_v60 = vmul.f32 %v3682_v36, %v3682_v36 }
 0xbe4   : > { %3687 = vadd.xlane.f32.xlu1 %v3684_v60 }
 0xc6d   : > { %v3686_v44 = vpop.xlane.xlu1 %3685 }
 0xc6e   : > { %v3689_v20 = vmul.f32 0.0078125, %v3686_v44 }
 0xc70   : > { %v3691_v31 = vadd.f32 1e-05, %v3689_v20 }
 0xc71   : > { %v3688_v40 = vpop.xlane.xlu1 %3687 }
 0xc72   : > { %4609 = vrsqrt.f32 %v3691_v31  ;;  %v3690_v8 = vmul.f32 0.0078125, %v3688_v40 }
 0xc74   : > { %v3692_v28 = vadd.f32 1e-05, %v3690_v8 }
 0xc76   : > { %4611 = vrsqrt.f32 %v3692_v28 }
 0xc7c   : > { %v4610_v46 = vpop.eup %4609 }
 0xc7d   : > { %v3695_v15 = vmul.f32 %v4610_v46, %v3681_v3 }
 0xc7f   : > { %v3703_v13 = vmul.f32 %v4116_v10, %v3695_v15 }
 0xc80   : > { %v4612_v57 = vpop.eup %4611 }
 0xc81   : > { %v3696_v55 = vmul.f32 %v4612_v57, %v3682_v36  ;;  %v3711_v16 = vadd.f32 %v4117_v56, %v3703_v13 }
 0xc83   : > { %v3704_v2 = vmul.f32 %v4116_v10, %v3696_v55 }
 0xc85   : > { %v3712_v51 = vadd.f32 %v4117_v56, %v3704_v2 }
 0xc87   : > { %v4130_v14 = vpack.c.bf16 %v3712_v51, %v3711_v16 }
 0xc89   : > { %4131 = vst [vmem:[%s5258_s25] sm:$0xff] %v4130_v14  }
 0xc8a PF: > { %s5978_s24 = sld [smem:[#allocation17_spill]]  ;;  %s5979_s21 = sld [smem:[#allocation13_spill]] }
 0xc8b   : > { %s5980_s22 = sld [smem:[#allocation14_spill]]  ;;  %s5981_s23 = sld [smem:[#allocation20_spill]] }
 0xc8c   : > { %s5983_s25 = sld [smem:[#allocation16_spill]]  ;;  %s5984_s26 = sld [smem:[#allocation18_spill]] }
 0xc8d   : > { %s5985_s27 = sld [smem:[#allocation19_spill]] }
 0xc90   : > { %s28_s28 = sadd.s32 1, %s5978_s24   ;;  %s5982_s24 = sld [smem:[#allocation15_spill]] }
 0xc91   : > { %p25_p9 = scmp.ge.s32.totalorder %s28_s28, 6  }
 0xc93   :  { %27 = sbr.rel (!%p25_p9) target bundleno = 21 (0x15), region = 191 }
 0xc9a   :  { %3745 = vsyncpa [#allocation4], 1 }
 0xc9b   :  { %3747 = vsyncpa [#allocation4 + $0x1], 1 }
 0xc9c   :  { %3748 = vsyncpa [#allocation6], 1 }

</bundles_post_ra>
